<compile_context>
chip_gen: v7x
topology: tpu7x:2x2x1
jax: 0.10.0
libtpu: 0.0.40
codegen_flags: <defaults>
</compile_context>

<pallas_src>
import functools

import jax
import jax.numpy as jnp
from jax.experimental import pallas as pl
from jax.experimental.pallas import tpu as pltpu

EPS = 1e-5
LANE = 128
SUBLANE = 16          # bf16 packed sublane group


def _gelu(x):
    # TODO(synk): eu.MLP source not provided; activation assumed GELU (tanh
    # approximation).  Structure (conv -> BN -> act, final_proc=True) matches.
    c = 0.7978845608028654
    return 0.5 * x * (1.0 + jnp.tanh(c * (x + 0.044715 * x * x * x)))


def _round_up(x, m):
    return (x + m - 1) // m * m


def _pick_tile(m, k):
    """Row tile: multiple of the bf16 sublane group, capped so the fused
    (k*tm, 128) operand and its f32 temporaries stay VMEM-friendly."""
    cap = max(256, (4096 // max(k, 1)) // SUBLANE * SUBLANE)
    cap = min(cap, 1024)
    return min(_round_up(m, SUBLANE), cap)


def _vmem_limit(k, tm, cin_p, c1p, c2p):
    """Derive the scoped-VMEM request from the actual block sizes."""
    b = 0
    b += 2 * k * tm * cin_p * 2                 # x block, double-buffered bf16
    b += 2 * tm * c2p * 4                       # out block, double-buffered f32
    b += (cin_p * c1p + c1p * c2p) * 2          # weights (bf16, resident)
    b += 8 * (c1p + c2p) * 4                    # packed scale/shift (+pad)
    b += 3 * k * tm * (c1p + c2p) * 4           # f32 temporaries headroom
    return int(min(max(b, 32 * 1024 * 1024), 64 * 1024 * 1024))


# ----------------------------- Pallas kernels -------------------------------

def _stats1_kernel(x_ref, w1_ref, ps_ref, *, k, tm, cin_p):
    """Per-tile partial sum / sum-of-squares of d1 = x @ w1.
    Zero pad rows/channels contribute exactly zero -> no masking needed."""
    x = x_ref[...].reshape(k * tm, cin_p)
    d1 = jnp.dot(x, w1_ref[...], preferred_element_type=jnp.float32)
    ps_ref[0:1, :] = jnp.sum(d1, axis=0, keepdims=True)
    ps_ref[1:2, :] = jnp.sum(d1 * d1, axis=0, keepdims=True)


def _stats2_kernel(x_ref, w1_ref, sc1_ref, w2_ref, ps_ref, *,
                   k, tm, cin_p, m_valid, mask_rows):
    """Recompute d1 -> folded-BN1 + GELU -> d2 = a1 @ w2; emit BN2 partials."""
    x = x_ref[...].reshape(k * tm, cin_p)
    d1 = jnp.dot(x, w1_ref[...], preferred_element_type=jnp.float32)
    a1 = _gelu(d1 * sc1_ref[0:1, :] + sc1_ref[1:2, :])
    if mask_rows:   # zero the (static) pad rows so they don't bias BN2 stats
        local = jax.lax.broadcasted_iota(jnp.int32, (k, tm, 1), 1)
        local = local.reshape(k * tm, 1)
        a1 = jnp.where(pl.program_id(0) * tm + local < m_valid, a1, 0.0)
    d2 = jnp.dot(a1.astype(w2_ref.dtype), w2_ref[...],
                 preferred_element_type=jnp.float32)
    ps_ref[0:1, :] = jnp.sum(d2, axis=0, keepdims=True)
    ps_ref[1:2, :] = jnp.sum(d2 * d2, axis=0, keepdims=True)


def _apply_kernel(x_ref, w1_ref, sc1_ref, w2_ref, sc2_ref, out_ref, *,
                  k, tm, cin_p, c2p):
    """Full edge-MLP with folded BN + GELU, then DGCNN max over k neighbors."""
    x = x_ref[...].reshape(k * tm, cin_p)
    d1 = jnp.dot(x, w1_ref[...], preferred_element_type=jnp.float32)
    a1 = _gelu(d1 * sc1_ref[0:1, :] + sc1_ref[1:2, :])
    d2 = jnp.dot(a1.astype(w2_ref.dtype), w2_ref[...],
                 preferred_element_type=jnp.float32)
    a2 = _gelu(d2 * sc2_ref[0:1, :] + sc2_ref[1:2, :])
    red = a2 if k == 1 else jnp.max(a2.reshape(k, tm, c2p), axis=0)
    out_ref[...] = red.astype(out_ref.dtype)


# --------------------------- block wrapper (host) ---------------------------

def _fold_bn(partials, g, be, inv_count):
    """Combine per-tile (sum, sumsq) partials -> folded BN scale/shift (2,C)."""
    tot = jnp.sum(partials, axis=0)                  # (2, C)
    mean = tot[0:1] * inv_count
    # single-pass E[x^2]-E[x]^2 in f32; fine while |mean|/std stays modest.
    var = jnp.maximum(tot[1:2] * inv_count - mean * mean, 0.0)
    scale = g * jax.lax.rsqrt(var + EPS)
    shift = be - mean * scale
    return jnp.concatenate([scale, shift], axis=0)   # row 0: scale, 1: shift


def gcn_block(x_kmc, layers, k, out_dim):
    """x_kmc: [k, M, Cin] f32 -> [M, out_dim] f32 (edge-MLP + neighbor max;
    k=1 degenerates to the pointwise conv3 MLP)."""
    (w1, g1, be1), (w2, g2, be2) = layers
    _, m, cin = x_kmc.shape
    cin_p, c1p = w1.shape
    c2p = w2.shape[1]

    tm = _pick_tile(m, k)
    m_pad = _round_up(m, tm)
    n_tiles = m_pad // tm
    inv_count = 1.0 / float(k * m)

    # Lane/row pad the activations (zeros are exactly neutral) and feed bf16.
    x = jnp.pad(x_kmc, ((0, 0), (0, m_pad - m), (0, cin_p - cin)))
    x = x.astype(jnp.bfloat16)

    x_spec = pl.BlockSpec((k, tm, cin_p), lambda i: (0, i, 0))
    w_spec = lambda r, c: pl.BlockSpec((r, c), lambda i: (0, 0))       # noqa: E731
    stat_spec = lambda c: pl.BlockSpec((None, 2, c), lambda i: (i, 0, 0))  # noqa: E731
    cp = pltpu.CompilerParams(
        dimension_semantics=("parallel",),
        vmem_limit_bytes=_vmem_limit(k, tm, cin_p, c1p, c2p))

    def call(kernel, in_specs, out_shape, out_spec, args):
        return pl.pallas_call(
            kernel, out_shape=out_shape,
            grid_spec=pltpu.PrefetchScalarGridSpec(
                num_scalar_prefetch=0, grid=(n_tiles,),
                in_specs=in_specs, out_specs=out_spec),
            compiler_params=cp)(*args)

    # Pass 1: BN1 batch stats (per-tile partials, combined in XLA).
    ps1 = call(functools.partial(_stats1_kernel, k=k, tm=tm, cin_p=cin_p),
               [x_spec, w_spec(cin_p, c1p)],
               jax.ShapeDtypeStruct((n_tiles, 2, c1p), jnp.float32),
               stat_spec(c1p), (x, w1))
    sc1 = _fold_bn(ps1, g1, be1, inv_count)

    # Pass 2: BN2 batch stats (recompute layer 1 instead of HBM round-trip).
    ps2 = call(functools.partial(_stats2_kernel, k=k, tm=tm, cin_p=cin_p,
                                 m_valid=m, mask_rows=(m_pad != m)),
               [x_spec, w_spec(cin_p, c1p), w_spec(2, c1p), w_spec(c1p, c2p)],
               jax.ShapeDtypeStruct((n_tiles, 2, c2p), jnp.float32),
               stat_spec(c2p), (x, w1, sc1, w2))
    sc2 = _fold_bn(ps2, g2, be2, inv_count)

    # Pass 3: apply both layers + neighbor max; each output tile written once.
    out = call(functools.partial(_apply_kernel, k=k, tm=tm, cin_p=cin_p, c2p=c2p),
               [x_spec, w_spec(cin_p, c1p), w_spec(2, c1p),
                w_spec(c1p, c2p), w_spec(2, c2p)],
               jax.ShapeDtypeStruct((m_pad, c2p), jnp.float32),
               pl.BlockSpec((tm, c2p), lambda i: (i, 0)),
               (x, w1, sc1, w2, sc2))
    return out[:m, :out_dim]


# ------------------------------ JAX glue ----------------------------------

def knn_indices(x_cl, k):
    # x_cl: [bs, n, c] -> [bs, n, k] indices of k nearest points (incl. self).
    # TODO(synk): knn / gather stay in XLA glue (data-dependent top_k).
    x_cl = x_cl.astype(jnp.float32)
    sq = jnp.sum(x_cl * x_cl, axis=-1, keepdims=True)
    inner = jnp.einsum("bnc,bmc->bnm", x_cl, x_cl,
                       precision=jax.lax.Precision.HIGHEST)
    neg_dist = -sq + 2.0 * inner - jnp.swapaxes(sq, 1, 2)
    _, idx = jax.lax.top_k(neg_dist, k)
    return idx


def get_graph_feature_cl(x_cl, k):
    # x_cl: [bs, n, c] -> [k, bs*n, 2c]; channel order = [neighbor-center, center]
    bs, n, c = x_cl.shape
    idx = knn_indices(x_cl, k)
    neigh = jax.vmap(lambda xb, ib: xb[ib])(x_cl, idx)          # [bs, n, k, c]
    cen = x_cl[:, :, None, :]
    feat = jnp.concatenate(
        [neigh - cen, jnp.broadcast_to(cen, neigh.shape)], axis=-1)
    return jnp.transpose(feat, (2, 0, 1, 3)).reshape(k, bs * n, 2 * c)


def gcn_encoder_dims(emb_in, emb_out):
    emb_inc = (emb_out / (4 * emb_in)) ** 0.25
    l1_0 = emb_in * 2
    l1_1 = int(l1_0 * emb_inc)
    l1_2 = int(l1_0 * emb_inc ** 2)
    l2_0 = l1_2 * 2
    l2_1 = int(l2_0 * emb_inc)
    l2_2 = emb_out
    l3_0 = l2_2 + l1_2
    l3_1 = int((emb_out / l3_0) ** 0.5 * l3_0)
    l3_2 = emb_out
    return {"conv1": (l1_0, l1_1, l1_2),
            "conv2": (l2_0, l2_1, l2_2),
            "conv3": (l3_0, l3_1, l3_2)}


def build_params(key, sp_in, sp_out):
    dims = gcn_encoder_dims(sp_in, sp_out)
    params = {}
    for name, (c0, c1, c2) in dims.items():
        layers = []
        for cin, cout in ((c0, c1), (c1, c2)):
            key, kw, kb, kg, kbe = jax.random.split(key, 5)
            w = jax.random.normal(kw, (cin, cout), jnp.float32) / jnp.sqrt(cin)
            b = 0.1 * jax.random.normal(kb, (1, cout), jnp.float32)
            g = 1.0 + 0.1 * jax.random.normal(kg, (1, cout), jnp.float32)
            be = 0.1 * jax.random.normal(kbe, (1, cout), jnp.float32)
            layers.append((w, b, g, be))
        params[name] = tuple(layers)
    return params, dims


def _pad_layer(w, g, be):
    """Zero-pad channels to multiples of 128 (lane-dense); weights -> bf16.
    Padding is exactly neutral: pad columns get scale=shift=0 -> gelu(0)=0."""
    cin, cout = w.shape
    cin_p, cout_p = _round_up(cin, LANE), _round_up(cout, LANE)
    wp = jnp.zeros((cin_p, cout_p), jnp.float32).at[:cin, :cout].set(w)

    def padv(v):
        return jnp.zeros((1, cout_p), jnp.float32).at[:, :cout].set(v)

    return wp.astype(jnp.bfloat16), padv(g), padv(be)


def prepare_kernel_params(params):
    """Kernel-side params: padded bf16 weights + padded gamma/beta per layer.
    The conv bias is dropped: with batch-statistics BN, BN(x@w + b) == BN(x@w),
    so it never affects the output (kept in the reference for fidelity)."""
    kparams, out_dims = {}, {}
    for name, layers in params.items():
        kparams[name] = tuple(_pad_layer(w, g, be) for (w, b, g, be) in layers)
        out_dims[name] = int(layers[1][0].shape[1])     # true C2 (static)
    return kparams, out_dims


def sparse_update_forward(sparse_fea, kparams, out_dims, n_near=2):
    """sparse_fea: [bs, emb_in, n_stk] -> [bs, emb_out, n_stk] (PyTorch NCL)."""
    bs, _, n = sparse_fea.shape
    k = n_near
    x_cl = jnp.transpose(sparse_fea, (0, 2, 1))                 # [bs, n, c]

    f1 = get_graph_feature_cl(x_cl, k)                          # [k, bs*n, 2c]
    x1_cl = gcn_block(f1, kparams["conv1"], k,
                      out_dims["conv1"]).reshape(bs, n, -1)

    f2 = get_graph_feature_cl(x1_cl, k)
    x2_cl = gcn_block(f2, kparams["conv2"], k,
                      out_dims["conv2"]).reshape(bs, n, -1)

    x3 = jnp.concatenate([x1_cl, x2_cl], axis=-1).reshape(1, bs * n, -1)
    out_cl = gcn_block(x3, kparams["conv3"], 1,
                       out_dims["conv3"]).reshape(bs, n, -1)
    return jnp.transpose(out_cl, (0, 2, 1))                     # [bs, emb_out, n]


# ----------------------- pure-JAX reference (check) ------------------------
# Mirrors the kernel's compute-dtype policy (bf16 MXU operands with f32
# accumulation, f32 BatchNorm with batch stats / biased var, tanh-GELU) but
# keeps the straightforward un-folded BN with biases.

def _ref_mlp(x, layers):
    for (w, b, g, be) in layers:
        h = jnp.dot(x.astype(jnp.bfloat16), w.astype(jnp.bfloat16),
                    preferred_element_type=jnp.float32) + b
        mean = h.mean(0, keepdims=True)
        var = ((h - mean) ** 2).mean(0, keepdims=True)
        x = _gelu((h - mean) / jnp.sqrt(var + EPS) * g + be)
    return x


def ref_forward(sparse_fea, params, n_near=2):
    bs, _, n = sparse_fea.shape
    k = n_near
    x_cl = jnp.transpose(sparse_fea, (0, 2, 1))

    def edge_block(xc, layers):
        f = get_graph_feature_cl(xc, k)                         # [k, bs*n, 2c]
        kk, m, c = f.shape
        h = _ref_mlp(f.reshape(kk * m, c), layers).reshape(kk, m, -1)
        return jnp.max(h, axis=0).reshape(bs, n, -1)

    x1 = edge_block(x_cl, params["conv1"])
    x2 = edge_block(x1, params["conv2"])
    x3 = jnp.concatenate([x1, x2], axis=-1).reshape(bs * n, -1)
    out = _ref_mlp(x3, params["conv3"]).reshape(bs, n, -1)
    return jnp.transpose(out, (0, 2, 1))


# --------------------------------- main ------------------------------------

if __name__ == "__main__":
    bs, sp_in, n_stk, sp_out, n_near = 2, 4, 8, 32, 2

    key = jax.random.PRNGKey(0)
    kx, kp = jax.random.split(key)
    sparse_fea = jax.random.normal(kx, (bs, sp_in, n_stk), jnp.float32)
    params, dims = build_params(kp, sp_in, sp_out)
    kparams, out_dims = prepare_kernel_params(params)

    fwd = jax.jit(functools.partial(sparse_update_forward,
                                    out_dims=out_dims, n_near=n_near))
    out = jax.block_until_ready(fwd(sparse_fea, kparams))
    assert out.shape == (bs, sp_out, n_stk), out.shape

    ref = ref_forward(sparse_fea, params, n_near=n_near)
    err = float(jnp.max(jnp.abs(out - ref)))
    assert err < 1e-2, f"max abs error vs reference: {err}"

    print("KERNEL_OK")
</pallas_src>

<mosaic_0001>
module attributes {stable_mosaic.version = 11 : i64} {
  func.func @_stats1_kernel(%arg0: i32, %arg1: memref<2x16x128xbf16, #tpu.memory_space<vmem>>, %arg2: memref<128x128xbf16, #tpu.memory_space<vmem>>, %arg3: memref<1x2x128xf32, #tpu.memory_space<vmem>>) attributes {dimension_semantics = [#tpu.dimension_semantics<parallel>], iteration_bounds = array<i64: 1>, scalar_prefetch = 0 : i64, scratch_operands = 0 : i64, tpu.core_type = #tpu.core_type<tc>, window_params = [{transform_indices = @transform_0, window_bounds = array<i64: 2, 16, 128>}, {pipeline_mode = #tpu.pipeline_mode<synchronous>, transform_indices = @transform_1, window_bounds = array<i64: 128, 128>}, {transform_indices = @transform_2, window_bounds = array<i64: 1, 2, 128>}]} {
    %c0 = arith.constant 0 : index
    %c0_0 = arith.constant 0 : index
    %c0_1 = arith.constant 0 : index
    %0 = vector.load %arg1[%c0, %c0_0, %c0_1] : memref<2x16x128xbf16, #tpu.memory_space<vmem>>, vector<2x16x128xbf16>
    %1 = vector.shape_cast %0 : vector<2x16x128xbf16> to vector<32x128xbf16>
    %c0_2 = arith.constant 0 : index
    %c0_3 = arith.constant 0 : index
    %2 = vector.load %arg2[%c0_2, %c0_3] : memref<128x128xbf16, #tpu.memory_space<vmem>>, vector<128x128xbf16>
    %cst = arith.constant dense<0.000000e+00> : vector<32x128xf32>
    %3 = tpu.matmul %1, %2, %cst {dimension_numbers = #tpu.dot_dimension_numbers<[1], [0], [0], [1], [0, 0, 1, 1], [], []>} : vector<32x128xbf16>, vector<128x128xbf16>, vector<32x128xf32> -> vector<32x128xf32>
    %cst_4 = arith.constant dense<0.000000e+00> : vector<128xf32>
    %4 = vector.multi_reduction <add>, %3, %cst_4 [0] : vector<32x128xf32> to vector<128xf32>
    %5 = vector.shape_cast %4 : vector<128xf32> to vector<1x128xf32>
    %c0_5 = arith.constant 0 : index
    %c0_6 = arith.constant 0 : index
    %c0_7 = arith.constant 0 : index
    %6 = vector.load %arg3[%c0_5, %c0_6, %c0_7] : memref<1x2x128xf32, #tpu.memory_space<vmem>>, vector<1x1x128xf32>
    %7 = vector.shape_cast %6 : vector<1x1x128xf32> to vector<1x128xf32>
    %8 = vector.shape_cast %5 : vector<1x128xf32> to vector<1x1x128xf32>
    tpu.vector_store %arg3[%c0_5, %c0_6, %c0_7], %8 {strides = array<i32>} : memref<1x2x128xf32, #tpu.memory_space<vmem>>, vector<1x1x128xf32>,
    %9 = arith.mulf %3, %3 : vector<32x128xf32>
    %cst_8 = arith.constant dense<0.000000e+00> : vector<128xf32>
    %10 = vector.multi_reduction <add>, %9, %cst_8 [0] : vector<32x128xf32> to vector<128xf32>
    %11 = vector.shape_cast %10 : vector<128xf32> to vector<1x128xf32>
    %c0_9 = arith.constant 0 : index
    %c1 = arith.constant 1 : index
    %c0_10 = arith.constant 0 : index
    %12 = vector.load %arg3[%c0_9, %c1, %c0_10] : memref<1x2x128xf32, #tpu.memory_space<vmem>>, vector<1x1x128xf32>
    %13 = vector.shape_cast %12 : vector<1x1x128xf32> to vector<1x128xf32>
    %14 = vector.shape_cast %11 : vector<1x128xf32> to vector<1x1x128xf32>
    tpu.vector_store %arg3[%c0_9, %c1, %c0_10], %14 {strides = array<i32>} : memref<1x2x128xf32, #tpu.memory_space<vmem>>, vector<1x1x128xf32>,
    return
  }
  func.func @transform_0(%arg0: i32) -> (i32, i32, i32) {
    %c0_i32 = arith.constant 0 : i32
    %c0_i32_0 = arith.constant 0 : i32
    %c0_i32_1 = arith.constant 0 : i32
    return %c0_i32, %arg0, %c0_i32_0 : i32, i32, i32
  }
  func.func @transform_1(%arg0: i32) -> (i32, i32) {
    %c0_i32 = arith.constant 0 : i32
    %c0_i32_0 = arith.constant 0 : i32
    %c0_i32_1 = arith.constant 0 : i32
    return %c0_i32, %c0_i32_0 : i32, i32
  }
  func.func @transform_2(%arg0: i32) -> (i32, i32, i32) {
    %c0_i32 = arith.constant 0 : i32
    %c0_i32_0 = arith.constant 0 : i32
    %c0_i32_1 = arith.constant 0 : i32
    return %arg0, %c0_i32, %c0_i32_0 : i32, i32, i32
  }
}

module attributes {stable_mosaic.version = 11 : i64} {
  func.func @_stats2_kernel(%arg0: i32, %arg1: memref<2x16x128xbf16, #tpu.memory_space<vmem>>, %arg2: memref<128x128xbf16, #tpu.memory_space<vmem>>, %arg3: memref<2x128xf32, #tpu.memory_space<vmem>>, %arg4: memref<128x128xbf16, #tpu.memory_space<vmem>>, %arg5: memref<1x2x128xf32, #tpu.memory_space<vmem>>) attributes {dimension_semantics = [#tpu.dimension_semantics<parallel>], iteration_bounds = array<i64: 1>, scalar_prefetch = 0 : i64, scratch_operands = 0 : i64, tpu.core_type = #tpu.core_type<tc>, window_params = [{transform_indices = @transform_0, window_bounds = array<i64: 2, 16, 128>}, {pipeline_mode = #tpu.pipeline_mode<synchronous>, transform_indices = @transform_1, window_bounds = array<i64: 128, 128>}, {pipeline_mode = #tpu.pipeline_mode<synchronous>, transform_indices = @transform_2, window_bounds = array<i64: 2, 128>}, {pipeline_mode = #tpu.pipeline_mode<synchronous>, transform_indices = @transform_3, window_bounds = array<i64: 128, 128>}, {transform_indices = @transform_4, window_bounds = array<i64: 1, 2, 128>}]} {
    %c0 = arith.constant 0 : index
    %c0_0 = arith.constant 0 : index
    %c0_1 = arith.constant 0 : index
    %0 = vector.load %arg1[%c0, %c0_0, %c0_1] : memref<2x16x128xbf16, #tpu.memory_space<vmem>>, vector<2x16x128xbf16>
    %1 = vector.shape_cast %0 : vector<2x16x128xbf16> to vector<32x128xbf16>
    %c0_2 = arith.constant 0 : index
    %c0_3 = arith.constant 0 : index
    %2 = vector.load %arg2[%c0_2, %c0_3] : memref<128x128xbf16, #tpu.memory_space<vmem>>, vector<128x128xbf16>
    %cst = arith.constant dense<0.000000e+00> : vector<32x128xf32>
    %3 = tpu.matmul %1, %2, %cst {dimension_numbers = #tpu.dot_dimension_numbers<[1], [0], [0], [1], [0, 0, 1, 1], [], []>} : vector<32x128xbf16>, vector<128x128xbf16>, vector<32x128xf32> -> vector<32x128xf32>
    %c0_4 = arith.constant 0 : index
    %c0_5 = arith.constant 0 : index
    %4 = vector.load %arg3[%c0_4, %c0_5] : memref<2x128xf32, #tpu.memory_space<vmem>>, vector<1x128xf32>
    %5 = vector.broadcast %4 : vector<1x128xf32> to vector<32x128xf32>
    %6 = arith.mulf %3, %5 : vector<32x128xf32>
    %c1 = arith.constant 1 : index
    %c0_6 = arith.constant 0 : index
    %7 = vector.load %arg3[%c1, %c0_6] : memref<2x128xf32, #tpu.memory_space<vmem>>, vector<1x128xf32>
    %8 = vector.broadcast %7 : vector<1x128xf32> to vector<32x128xf32>
    %9 = arith.addf %6, %8 : vector<32x128xf32>
    %cst_7 = arith.constant 5.000000e-01 : f32
    %10 = vector.broadcast %cst_7 : f32 to vector<32x128xf32>
    %11 = arith.mulf %10, %9 : vector<32x128xf32>
    %cst_8 = arith.constant 4.471500e-02 : f32
    %12 = vector.broadcast %cst_8 : f32 to vector<32x128xf32>
    %13 = arith.mulf %12, %9 : vector<32x128xf32>
    %14 = arith.mulf %13, %9 : vector<32x128xf32>
    %15 = arith.mulf %14, %9 : vector<32x128xf32>
    %16 = arith.addf %9, %15 : vector<32x128xf32>
    %cst_9 = arith.constant 0.797884583 : f32
    %17 = vector.broadcast %cst_9 : f32 to vector<32x128xf32>
    %18 = arith.mulf %17, %16 : vector<32x128xf32>
    %19 = math.tanh %18 : vector<32x128xf32>
    %cst_10 = arith.constant 1.000000e+00 : f32
    %20 = vector.broadcast %cst_10 : f32 to vector<32x128xf32>
    %21 = arith.addf %20, %19 : vector<32x128xf32>
    %22 = arith.mulf %11, %21 : vector<32x128xf32>
    %23 = arith.truncf %22 : vector<32x128xf32> to vector<32x128xbf16>
    %c0_11 = arith.constant 0 : index
    %c0_12 = arith.constant 0 : index
    %24 = vector.load %arg4[%c0_11, %c0_12] : memref<128x128xbf16, #tpu.memory_space<vmem>>, vector<128x128xbf16>
    %cst_13 = arith.constant dense<0.000000e+00> : vector<32x128xf32>
    %25 = tpu.matmul %23, %24, %cst_13 {dimension_numbers = #tpu.dot_dimension_numbers<[1], [0], [0], [1], [0, 0, 1, 1], [], []>} : vector<32x128xbf16>, vector<128x128xbf16>, vector<32x128xf32> -> vector<32x128xf32>
    %cst_14 = arith.constant dense<0.000000e+00> : vector<128xf32>
    %26 = vector.multi_reduction <add>, %25, %cst_14 [0] : vector<32x128xf32> to vector<128xf32>
    %27 = vector.shape_cast %26 : vector<128xf32> to vector<1x128xf32>
    %c0_15 = arith.constant 0 : index
    %c0_16 = arith.constant 0 : index
    %c0_17 = arith.constant 0 : index
    %28 = vector.load %arg5[%c0_15, %c0_16, %c0_17] : memref<1x2x128xf32, #tpu.memory_space<vmem>>, vector<1x1x128xf32>
    %29 = vector.shape_cast %28 : vector<1x1x128xf32> to vector<1x128xf32>
    %30 = vector.shape_cast %27 : vector<1x128xf32> to vector<1x1x128xf32>
    tpu.vector_store %arg5[%c0_15, %c0_16, %c0_17], %30 {strides = array<i32>} : memref<1x2x128xf32, #tpu.memory_space<vmem>>, vector<1x1x128xf32>,
    %31 = arith.mulf %25, %25 : vector<32x128xf32>
    %cst_18 = arith.constant dense<0.000000e+00> : vector<128xf32>
    %32 = vector.multi_reduction <add>, %31, %cst_18 [0] : vector<32x128xf32> to vector<128xf32>
    %33 = vector.shape_cast %32 : vector<128xf32> to vector<1x128xf32>
    %c0_19 = arith.constant 0 : index
    %c1_20 = arith.constant 1 : index
    %c0_21 = arith.constant 0 : index
    %34 = vector.load %arg5[%c0_19, %c1_20, %c0_21] : memref<1x2x128xf32, #tpu.memory_space<vmem>>, vector<1x1x128xf32>
    %35 = vector.shape_cast %34 : vector<1x1x128xf32> to vector<1x128xf32>
    %36 = vector.shape_cast %33 : vector<1x128xf32> to vector<1x1x128xf32>
    tpu.vector_store %arg5[%c0_19, %c1_20, %c0_21], %36 {strides = array<i32>} : memref<1x2x128xf32, #tpu.memory_space<vmem>>, vector<1x1x128xf32>,
    return
  }
  func.func @transform_0(%arg0: i32) -> (i32, i32, i32) {
    %c0_i32 = arith.constant 0 : i32
    %c0_i32_0 = arith.constant 0 : i32
    %c0_i32_1 = arith.constant 0 : i32
    return %c0_i32, %arg0, %c0_i32_0 : i32, i32, i32
  }
  func.func @transform_1(%arg0: i32) -> (i32, i32) {
    %c0_i32 = arith.constant 0 : i32
    %c0_i32_0 = arith.constant 0 : i32
    %c0_i32_1 = arith.constant 0 : i32
    return %c0_i32, %c0_i32_0 : i32, i32
  }
  func.func @transform_2(%arg0: i32) -> (i32, i32) {
    %c0_i32 = arith.constant 0 : i32
    %c0_i32_0 = arith.constant 0 : i32
    %c0_i32_1 = arith.constant 0 : i32
    return %c0_i32, %c0_i32_0 : i32, i32
  }
  func.func @transform_3(%arg0: i32) -> (i32, i32) {
    %c0_i32 = arith.constant 0 : i32
    %c0_i32_0 = arith.constant 0 : i32
    %c0_i32_1 = arith.constant 0 : i32
    return %c0_i32, %c0_i32_0 : i32, i32
  }
  func.func @transform_4(%arg0: i32) -> (i32, i32, i32) {
    %c0_i32 = arith.constant 0 : i32
    %c0_i32_0 = arith.constant 0 : i32
    %c0_i32_1 = arith.constant 0 : i32
    return %arg0, %c0_i32, %c0_i32_0 : i32, i32, i32
  }
}

module attributes {stable_mosaic.version = 11 : i64} {
  func.func @_apply_kernel(%arg0: i32, %arg1: memref<2x16x128xbf16, #tpu.memory_space<vmem>>, %arg2: memref<128x128xbf16, #tpu.memory_space<vmem>>, %arg3: memref<2x128xf32, #tpu.memory_space<vmem>>, %arg4: memref<128x128xbf16, #tpu.memory_space<vmem>>, %arg5: memref<2x128xf32, #tpu.memory_space<vmem>>, %arg6: memref<16x128xf32, #tpu.memory_space<vmem>>) attributes {dimension_semantics = [#tpu.dimension_semantics<parallel>], iteration_bounds = array<i64: 1>, scalar_prefetch = 0 : i64, scratch_operands = 0 : i64, tpu.core_type = #tpu.core_type<tc>, window_params = [{transform_indices = @transform_0, window_bounds = array<i64: 2, 16, 128>}, {pipeline_mode = #tpu.pipeline_mode<synchronous>, transform_indices = @transform_1, window_bounds = array<i64: 128, 128>}, {pipeline_mode = #tpu.pipeline_mode<synchronous>, transform_indices = @transform_2, window_bounds = array<i64: 2, 128>}, {pipeline_mode = #tpu.pipeline_mode<synchronous>, transform_indices = @transform_3, window_bounds = array<i64: 128, 128>}, {pipeline_mode = #tpu.pipeline_mode<synchronous>, transform_indices = @transform_4, window_bounds = array<i64: 2, 128>}, {transform_indices = @transform_5, window_bounds = array<i64: 16, 128>}]} {
    %c0 = arith.constant 0 : index
    %c0_0 = arith.constant 0 : index
    %c0_1 = arith.constant 0 : index
    %0 = vector.load %arg1[%c0, %c0_0, %c0_1] : memref<2x16x128xbf16, #tpu.memory_space<vmem>>, vector<2x16x128xbf16>
    %1 = vector.shape_cast %0 : vector<2x16x128xbf16> to vector<32x128xbf16>
    %c0_2 = arith.constant 0 : index
    %c0_3 = arith.constant 0 : index
    %2 = vector.load %arg2[%c0_2, %c0_3] : memref<128x128xbf16, #tpu.memory_space<vmem>>, vector<128x128xbf16>
    %cst = arith.constant dense<0.000000e+00> : vector<32x128xf32>
    %3 = tpu.matmul %1, %2, %cst {dimension_numbers = #tpu.dot_dimension_numbers<[1], [0], [0], [1], [0, 0, 1, 1], [], []>} : vector<32x128xbf16>, vector<128x128xbf16>, vector<32x128xf32> -> vector<32x128xf32>
    %c0_4 = arith.constant 0 : index
    %c0_5 = arith.constant 0 : index
    %4 = vector.load %arg3[%c0_4, %c0_5] : memref<2x128xf32, #tpu.memory_space<vmem>>, vector<1x128xf32>
    %5 = vector.broadcast %4 : vector<1x128xf32> to vector<32x128xf32>
    %6 = arith.mulf %3, %5 : vector<32x128xf32>
    %c1 = arith.constant 1 : index
    %c0_6 = arith.constant 0 : index
    %7 = vector.load %arg3[%c1, %c0_6] : memref<2x128xf32, #tpu.memory_space<vmem>>, vector<1x128xf32>
    %8 = vector.broadcast %7 : vector<1x128xf32> to vector<32x128xf32>
    %9 = arith.addf %6, %8 : vector<32x128xf32>
    %cst_7 = arith.constant 5.000000e-01 : f32
    %10 = vector.broadcast %cst_7 : f32 to vector<32x128xf32>
    %11 = arith.mulf %10, %9 : vector<32x128xf32>
    %cst_8 = arith.constant 4.471500e-02 : f32
    %12 = vector.broadcast %cst_8 : f32 to vector<32x128xf32>
    %13 = arith.mulf %12, %9 : vector<32x128xf32>
    %14 = arith.mulf %13, %9 : vector<32x128xf32>
    %15 = arith.mulf %14, %9 : vector<32x128xf32>
    %16 = arith.addf %9, %15 : vector<32x128xf32>
    %cst_9 = arith.constant 0.797884583 : f32
    %17 = vector.broadcast %cst_9 : f32 to vector<32x128xf32>
    %18 = arith.mulf %17, %16 : vector<32x128xf32>
    %19 = math.tanh %18 : vector<32x128xf32>
    %cst_10 = arith.constant 1.000000e+00 : f32
    %20 = vector.broadcast %cst_10 : f32 to vector<32x128xf32>
    %21 = arith.addf %20, %19 : vector<32x128xf32>
    %22 = arith.mulf %11, %21 : vector<32x128xf32>
    %23 = arith.truncf %22 : vector<32x128xf32> to vector<32x128xbf16>
    %c0_11 = arith.constant 0 : index
    %c0_12 = arith.constant 0 : index
    %24 = vector.load %arg4[%c0_11, %c0_12] : memref<128x128xbf16, #tpu.memory_space<vmem>>, vector<128x128xbf16>
    %cst_13 = arith.constant dense<0.000000e+00> : vector<32x128xf32>
    %25 = tpu.matmul %23, %24, %cst_13 {dimension_numbers = #tpu.dot_dimension_numbers<[1], [0], [0], [1], [0, 0, 1, 1], [], []>} : vector<32x128xbf16>, vector<128x128xbf16>, vector<32x128xf32> -> vector<32x128xf32>
    %c0_14 = arith.constant 0 : index
    %c0_15 = arith.constant 0 : index
    %26 = vector.load %arg5[%c0_14, %c0_15] : memref<2x128xf32, #tpu.memory_space<vmem>>, vector<1x128xf32>
    %27 = vector.broadcast %26 : vector<1x128xf32> to vector<32x128xf32>
    %28 = arith.mulf %25, %27 : vector<32x128xf32>
    %c1_16 = arith.constant 1 : index
    %c0_17 = arith.constant 0 : index
    %29 = vector.load %arg5[%c1_16, %c0_17] : memref<2x128xf32, #tpu.memory_space<vmem>>, vector<1x128xf32>
    %30 = vector.broadcast %29 : vector<1x128xf32> to vector<32x128xf32>
    %31 = arith.addf %28, %30 : vector<32x128xf32>
    %cst_18 = arith.constant 5.000000e-01 : f32
    %32 = vector.broadcast %cst_18 : f32 to vector<32x128xf32>
    %33 = arith.mulf %32, %31 : vector<32x128xf32>
    %cst_19 = arith.constant 4.471500e-02 : f32
    %34 = vector.broadcast %cst_19 : f32 to vector<32x128xf32>
    %35 = arith.mulf %34, %31 : vector<32x128xf32>
    %36 = arith.mulf %35, %31 : vector<32x128xf32>
    %37 = arith.mulf %36, %31 : vector<32x128xf32>
    %38 = arith.addf %31, %37 : vector<32x128xf32>
    %cst_20 = arith.constant 0.797884583 : f32
    %39 = vector.broadcast %cst_20 : f32 to vector<32x128xf32>
    %40 = arith.mulf %39, %38 : vector<32x128xf32>
    %41 = math.tanh %40 : vector<32x128xf32>
    %cst_21 = arith.constant 1.000000e+00 : f32
    %42 = vector.broadcast %cst_21 : f32 to vector<32x128xf32>
    %43 = arith.addf %42, %41 : vector<32x128xf32>
    %44 = arith.mulf %33, %43 : vector<32x128xf32>
    %45 = vector.shape_cast %44 : vector<32x128xf32> to vector<2x16x128xf32>
    %cst_22 = arith.constant dense<0xFF800000> : vector<16x128xf32>
    %46 = vector.multi_reduction <maximumf>, %45, %cst_22 [0] : vector<2x16x128xf32> to vector<16x128xf32>
    %c0_23 = arith.constant 0 : index
    %c0_24 = arith.constant 0 : index
    %47 = vector.load %arg6[%c0_23, %c0_24] : memref<16x128xf32, #tpu.memory_space<vmem>>, vector<16x128xf32>
    tpu.vector_store %arg6[%c0_23, %c0_24], %46 {strides = array<i32>} : memref<16x128xf32, #tpu.memory_space<vmem>>, vector<16x128xf32>,
    return
  }
  func.func @transform_0(%arg0: i32) -> (i32, i32, i32) {
    %c0_i32 = arith.constant 0 : i32
    %c0_i32_0 = arith.constant 0 : i32
    %c0_i32_1 = arith.constant 0 : i32
    return %c0_i32, %arg0, %c0_i32_0 : i32, i32, i32
  }
  func.func @transform_1(%arg0: i32) -> (i32, i32) {
    %c0_i32 = arith.constant 0 : i32
    %c0_i32_0 = arith.constant 0 : i32
    %c0_i32_1 = arith.constant 0 : i32
    return %c0_i32, %c0_i32_0 : i32, i32
  }
  func.func @transform_2(%arg0: i32) -> (i32, i32) {
    %c0_i32 = arith.constant 0 : i32
    %c0_i32_0 = arith.constant 0 : i32
    %c0_i32_1 = arith.constant 0 : i32
    return %c0_i32, %c0_i32_0 : i32, i32
  }
  func.func @transform_3(%arg0: i32) -> (i32, i32) {
    %c0_i32 = arith.constant 0 : i32
    %c0_i32_0 = arith.constant 0 : i32
    %c0_i32_1 = arith.constant 0 : i32
    return %c0_i32, %c0_i32_0 : i32, i32
  }
  func.func @transform_4(%arg0: i32) -> (i32, i32) {
    %c0_i32 = arith.constant 0 : i32
    %c0_i32_0 = arith.constant 0 : i32
    %c0_i32_1 = arith.constant 0 : i32
    return %c0_i32, %c0_i32_0 : i32, i32
  }
  func.func @transform_5(%arg0: i32) -> (i32, i32) {
    %c0_i32 = arith.constant 0 : i32
    %c0_i32_0 = arith.constant 0 : i32
    return %arg0, %c0_i32 : i32, i32
  }
}

module attributes {stable_mosaic.version = 11 : i64} {
  func.func @_stats2_kernel(%arg0: i32, %arg1: memref<1x16x128xbf16, #tpu.memory_space<vmem>>, %arg2: memref<128x128xbf16, #tpu.memory_space<vmem>>, %arg3: memref<2x128xf32, #tpu.memory_space<vmem>>, %arg4: memref<128x128xbf16, #tpu.memory_space<vmem>>, %arg5: memref<1x2x128xf32, #tpu.memory_space<vmem>>) attributes {dimension_semantics = [#tpu.dimension_semantics<parallel>], iteration_bounds = array<i64: 1>, scalar_prefetch = 0 : i64, scratch_operands = 0 : i64, tpu.core_type = #tpu.core_type<tc>, window_params = [{transform_indices = @transform_0, window_bounds = array<i64: 1, 16, 128>}, {pipeline_mode = #tpu.pipeline_mode<synchronous>, transform_indices = @transform_1, window_bounds = array<i64: 128, 128>}, {pipeline_mode = #tpu.pipeline_mode<synchronous>, transform_indices = @transform_2, window_bounds = array<i64: 2, 128>}, {pipeline_mode = #tpu.pipeline_mode<synchronous>, transform_indices = @transform_3, window_bounds = array<i64: 128, 128>}, {transform_indices = @transform_4, window_bounds = array<i64: 1, 2, 128>}]} {
    %c0 = arith.constant 0 : index
    %c0_0 = arith.constant 0 : index
    %c0_1 = arith.constant 0 : index
    %0 = vector.load %arg1[%c0, %c0_0, %c0_1] : memref<1x16x128xbf16, #tpu.memory_space<vmem>>, vector<1x16x128xbf16>
    %1 = vector.shape_cast %0 : vector<1x16x128xbf16> to vector<16x128xbf16>
    %c0_2 = arith.constant 0 : index
    %c0_3 = arith.constant 0 : index
    %2 = vector.load %arg2[%c0_2, %c0_3] : memref<128x128xbf16, #tpu.memory_space<vmem>>, vector<128x128xbf16>
    %cst = arith.constant dense<0.000000e+00> : vector<16x128xf32>
    %3 = tpu.matmul %1, %2, %cst {dimension_numbers = #tpu.dot_dimension_numbers<[1], [0], [0], [1], [0, 0, 1, 1], [], []>} : vector<16x128xbf16>, vector<128x128xbf16>, vector<16x128xf32> -> vector<16x128xf32>
    %c0_4 = arith.constant 0 : index
    %c0_5 = arith.constant 0 : index
    %4 = vector.load %arg3[%c0_4, %c0_5] : memref<2x128xf32, #tpu.memory_space<vmem>>, vector<1x128xf32>
    %5 = vector.broadcast %4 : vector<1x128xf32> to vector<16x128xf32>
    %6 = arith.mulf %3, %5 : vector<16x128xf32>
    %c1 = arith.constant 1 : index
    %c0_6 = arith.constant 0 : index
    %7 = vector.load %arg3[%c1, %c0_6] : memref<2x128xf32, #tpu.memory_space<vmem>>, vector<1x128xf32>
    %8 = vector.broadcast %7 : vector<1x128xf32> to vector<16x128xf32>
    %9 = arith.addf %6, %8 : vector<16x128xf32>
    %cst_7 = arith.constant 5.000000e-01 : f32
    %10 = vector.broadcast %cst_7 : f32 to vector<16x128xf32>
    %11 = arith.mulf %10, %9 : vector<16x128xf32>
    %cst_8 = arith.constant 4.471500e-02 : f32
    %12 = vector.broadcast %cst_8 : f32 to vector<16x128xf32>
    %13 = arith.mulf %12, %9 : vector<16x128xf32>
    %14 = arith.mulf %13, %9 : vector<16x128xf32>
    %15 = arith.mulf %14, %9 : vector<16x128xf32>
    %16 = arith.addf %9, %15 : vector<16x128xf32>
    %cst_9 = arith.constant 0.797884583 : f32
    %17 = vector.broadcast %cst_9 : f32 to vector<16x128xf32>
    %18 = arith.mulf %17, %16 : vector<16x128xf32>
    %19 = math.tanh %18 : vector<16x128xf32>
    %cst_10 = arith.constant 1.000000e+00 : f32
    %20 = vector.broadcast %cst_10 : f32 to vector<16x128xf32>
    %21 = arith.addf %20, %19 : vector<16x128xf32>
    %22 = arith.mulf %11, %21 : vector<16x128xf32>
    %23 = arith.truncf %22 : vector<16x128xf32> to vector<16x128xbf16>
    %c0_11 = arith.constant 0 : index
    %c0_12 = arith.constant 0 : index
    %24 = vector.load %arg4[%c0_11, %c0_12] : memref<128x128xbf16, #tpu.memory_space<vmem>>, vector<128x128xbf16>
    %cst_13 = arith.constant dense<0.000000e+00> : vector<16x128xf32>
    %25 = tpu.matmul %23, %24, %cst_13 {dimension_numbers = #tpu.dot_dimension_numbers<[1], [0], [0], [1], [0, 0, 1, 1], [], []>} : vector<16x128xbf16>, vector<128x128xbf16>, vector<16x128xf32> -> vector<16x128xf32>
    %cst_14 = arith.constant dense<0.000000e+00> : vector<128xf32>
    %26 = vector.multi_reduction <add>, %25, %cst_14 [0] : vector<16x128xf32> to vector<128xf32>
    %27 = vector.shape_cast %26 : vector<128xf32> to vector<1x128xf32>
    %c0_15 = arith.constant 0 : index
    %c0_16 = arith.constant 0 : index
    %c0_17 = arith.constant 0 : index
    %28 = vector.load %arg5[%c0_15, %c0_16, %c0_17] : memref<1x2x128xf32, #tpu.memory_space<vmem>>, vector<1x1x128xf32>
    %29 = vector.shape_cast %28 : vector<1x1x128xf32> to vector<1x128xf32>
    %30 = vector.shape_cast %27 : vector<1x128xf32> to vector<1x1x128xf32>
    tpu.vector_store %arg5[%c0_15, %c0_16, %c0_17], %30 {strides = array<i32>} : memref<1x2x128xf32, #tpu.memory_space<vmem>>, vector<1x1x128xf32>,
    %31 = arith.mulf %25, %25 : vector<16x128xf32>
    %cst_18 = arith.constant dense<0.000000e+00> : vector<128xf32>
    %32 = vector.multi_reduction <add>, %31, %cst_18 [0] : vector<16x128xf32> to vector<128xf32>
    %33 = vector.shape_cast %32 : vector<128xf32> to vector<1x128xf32>
    %c0_19 = arith.constant 0 : index
    %c1_20 = arith.constant 1 : index
    %c0_21 = arith.constant 0 : index
    %34 = vector.load %arg5[%c0_19, %c1_20, %c0_21] : memref<1x2x128xf32, #tpu.memory_space<vmem>>, vector<1x1x128xf32>
    %35 = vector.shape_cast %34 : vector<1x1x128xf32> to vector<1x128xf32>
    %36 = vector.shape_cast %33 : vector<1x128xf32> to vector<1x1x128xf32>
    tpu.vector_store %arg5[%c0_19, %c1_20, %c0_21], %36 {strides = array<i32>} : memref<1x2x128xf32, #tpu.memory_space<vmem>>, vector<1x1x128xf32>,
    return
  }
  func.func @transform_0(%arg0: i32) -> (i32, i32, i32) {
    %c0_i32 = arith.constant 0 : i32
    %c0_i32_0 = arith.constant 0 : i32
    %c0_i32_1 = arith.constant 0 : i32
    return %c0_i32, %arg0, %c0_i32_0 : i32, i32, i32
  }
  func.func @transform_1(%arg0: i32) -> (i32, i32) {
    %c0_i32 = arith.constant 0 : i32
    %c0_i32_0 = arith.constant 0 : i32
    %c0_i32_1 = arith.constant 0 : i32
    return %c0_i32, %c0_i32_0 : i32, i32
  }
  func.func @transform_2(%arg0: i32) -> (i32, i32) {
    %c0_i32 = arith.constant 0 : i32
    %c0_i32_0 = arith.constant 0 : i32
    %c0_i32_1 = arith.constant 0 : i32
    return %c0_i32, %c0_i32_0 : i32, i32
  }
  func.func @transform_3(%arg0: i32) -> (i32, i32) {
    %c0_i32 = arith.constant 0 : i32
    %c0_i32_0 = arith.constant 0 : i32
    %c0_i32_1 = arith.constant 0 : i32
    return %c0_i32, %c0_i32_0 : i32, i32
  }
  func.func @transform_4(%arg0: i32) -> (i32, i32, i32) {
    %c0_i32 = arith.constant 0 : i32
    %c0_i32_0 = arith.constant 0 : i32
    %c0_i32_1 = arith.constant 0 : i32
    return %arg0, %c0_i32, %c0_i32_0 : i32, i32, i32
  }
}

module attributes {stable_mosaic.version = 11 : i64} {
  func.func @_stats1_kernel(%arg0: i32, %arg1: memref<1x16x128xbf16, #tpu.memory_space<vmem>>, %arg2: memref<128x128xbf16, #tpu.memory_space<vmem>>, %arg3: memref<1x2x128xf32, #tpu.memory_space<vmem>>) attributes {dimension_semantics = [#tpu.dimension_semantics<parallel>], iteration_bounds = array<i64: 1>, scalar_prefetch = 0 : i64, scratch_operands = 0 : i64, tpu.core_type = #tpu.core_type<tc>, window_params = [{transform_indices = @transform_0, window_bounds = array<i64: 1, 16, 128>}, {pipeline_mode = #tpu.pipeline_mode<synchronous>, transform_indices = @transform_1, window_bounds = array<i64: 128, 128>}, {transform_indices = @transform_2, window_bounds = array<i64: 1, 2, 128>}]} {
    %c0 = arith.constant 0 : index
    %c0_0 = arith.constant 0 : index
    %c0_1 = arith.constant 0 : index
    %0 = vector.load %arg1[%c0, %c0_0, %c0_1] : memref<1x16x128xbf16, #tpu.memory_space<vmem>>, vector<1x16x128xbf16>
    %1 = vector.shape_cast %0 : vector<1x16x128xbf16> to vector<16x128xbf16>
    %c0_2 = arith.constant 0 : index
    %c0_3 = arith.constant 0 : index
    %2 = vector.load %arg2[%c0_2, %c0_3] : memref<128x128xbf16, #tpu.memory_space<vmem>>, vector<128x128xbf16>
    %cst = arith.constant dense<0.000000e+00> : vector<16x128xf32>
    %3 = tpu.matmul %1, %2, %cst {dimension_numbers = #tpu.dot_dimension_numbers<[1], [0], [0], [1], [0, 0, 1, 1], [], []>} : vector<16x128xbf16>, vector<128x128xbf16>, vector<16x128xf32> -> vector<16x128xf32>
    %cst_4 = arith.constant dense<0.000000e+00> : vector<128xf32>
    %4 = vector.multi_reduction <add>, %3, %cst_4 [0] : vector<16x128xf32> to vector<128xf32>
    %5 = vector.shape_cast %4 : vector<128xf32> to vector<1x128xf32>
    %c0_5 = arith.constant 0 : index
    %c0_6 = arith.constant 0 : index
    %c0_7 = arith.constant 0 : index
    %6 = vector.load %arg3[%c0_5, %c0_6, %c0_7] : memref<1x2x128xf32, #tpu.memory_space<vmem>>, vector<1x1x128xf32>
    %7 = vector.shape_cast %6 : vector<1x1x128xf32> to vector<1x128xf32>
    %8 = vector.shape_cast %5 : vector<1x128xf32> to vector<1x1x128xf32>
    tpu.vector_store %arg3[%c0_5, %c0_6, %c0_7], %8 {strides = array<i32>} : memref<1x2x128xf32, #tpu.memory_space<vmem>>, vector<1x1x128xf32>,
    %9 = arith.mulf %3, %3 : vector<16x128xf32>
    %cst_8 = arith.constant dense<0.000000e+00> : vector<128xf32>
    %10 = vector.multi_reduction <add>, %9, %cst_8 [0] : vector<16x128xf32> to vector<128xf32>
    %11 = vector.shape_cast %10 : vector<128xf32> to vector<1x128xf32>
    %c0_9 = arith.constant 0 : index
    %c1 = arith.constant 1 : index
    %c0_10 = arith.constant 0 : index
    %12 = vector.load %arg3[%c0_9, %c1, %c0_10] : memref<1x2x128xf32, #tpu.memory_space<vmem>>, vector<1x1x128xf32>
    %13 = vector.shape_cast %12 : vector<1x1x128xf32> to vector<1x128xf32>
    %14 = vector.shape_cast %11 : vector<1x128xf32> to vector<1x1x128xf32>
    tpu.vector_store %arg3[%c0_9, %c1, %c0_10], %14 {strides = array<i32>} : memref<1x2x128xf32, #tpu.memory_space<vmem>>, vector<1x1x128xf32>,
    return
  }
  func.func @transform_0(%arg0: i32) -> (i32, i32, i32) {
    %c0_i32 = arith.constant 0 : i32
    %c0_i32_0 = arith.constant 0 : i32
    %c0_i32_1 = arith.constant 0 : i32
    return %c0_i32, %arg0, %c0_i32_0 : i32, i32, i32
  }
  func.func @transform_1(%arg0: i32) -> (i32, i32) {
    %c0_i32 = arith.constant 0 : i32
    %c0_i32_0 = arith.constant 0 : i32
    %c0_i32_1 = arith.constant 0 : i32
    return %c0_i32, %c0_i32_0 : i32, i32
  }
  func.func @transform_2(%arg0: i32) -> (i32, i32, i32) {
    %c0_i32 = arith.constant 0 : i32
    %c0_i32_0 = arith.constant 0 : i32
    %c0_i32_1 = arith.constant 0 : i32
    return %arg0, %c0_i32, %c0_i32_0 : i32, i32, i32
  }
}

module attributes {stable_mosaic.version = 11 : i64} {
  func.func @_apply_kernel(%arg0: i32, %arg1: memref<1x16x128xbf16, #tpu.memory_space<vmem>>, %arg2: memref<128x128xbf16, #tpu.memory_space<vmem>>, %arg3: memref<2x128xf32, #tpu.memory_space<vmem>>, %arg4: memref<128x128xbf16, #tpu.memory_space<vmem>>, %arg5: memref<2x128xf32, #tpu.memory_space<vmem>>, %arg6: memref<16x128xf32, #tpu.memory_space<vmem>>) attributes {dimension_semantics = [#tpu.dimension_semantics<parallel>], iteration_bounds = array<i64: 1>, scalar_prefetch = 0 : i64, scratch_operands = 0 : i64, tpu.core_type = #tpu.core_type<tc>, window_params = [{transform_indices = @transform_0, window_bounds = array<i64: 1, 16, 128>}, {pipeline_mode = #tpu.pipeline_mode<synchronous>, transform_indices = @transform_1, window_bounds = array<i64: 128, 128>}, {pipeline_mode = #tpu.pipeline_mode<synchronous>, transform_indices = @transform_2, window_bounds = array<i64: 2, 128>}, {pipeline_mode = #tpu.pipeline_mode<synchronous>, transform_indices = @transform_3, window_bounds = array<i64: 128, 128>}, {pipeline_mode = #tpu.pipeline_mode<synchronous>, transform_indices = @transform_4, window_bounds = array<i64: 2, 128>}, {transform_indices = @transform_5, window_bounds = array<i64: 16, 128>}]} {
    %c0 = arith.constant 0 : index
    %c0_0 = arith.constant 0 : index
    %c0_1 = arith.constant 0 : index
    %0 = vector.load %arg1[%c0, %c0_0, %c0_1] : memref<1x16x128xbf16, #tpu.memory_space<vmem>>, vector<1x16x128xbf16>
    %1 = vector.shape_cast %0 : vector<1x16x128xbf16> to vector<16x128xbf16>
    %c0_2 = arith.constant 0 : index
    %c0_3 = arith.constant 0 : index
    %2 = vector.load %arg2[%c0_2, %c0_3] : memref<128x128xbf16, #tpu.memory_space<vmem>>, vector<128x128xbf16>
    %cst = arith.constant dense<0.000000e+00> : vector<16x128xf32>
    %3 = tpu.matmul %1, %2, %cst {dimension_numbers = #tpu.dot_dimension_numbers<[1], [0], [0], [1], [0, 0, 1, 1], [], []>} : vector<16x128xbf16>, vector<128x128xbf16>, vector<16x128xf32> -> vector<16x128xf32>
    %c0_4 = arith.constant 0 : index
    %c0_5 = arith.constant 0 : index
    %4 = vector.load %arg3[%c0_4, %c0_5] : memref<2x128xf32, #tpu.memory_space<vmem>>, vector<1x128xf32>
    %5 = vector.broadcast %4 : vector<1x128xf32> to vector<16x128xf32>
    %6 = arith.mulf %3, %5 : vector<16x128xf32>
    %c1 = arith.constant 1 : index
    %c0_6 = arith.constant 0 : index
    %7 = vector.load %arg3[%c1, %c0_6] : memref<2x128xf32, #tpu.memory_space<vmem>>, vector<1x128xf32>
    %8 = vector.broadcast %7 : vector<1x128xf32> to vector<16x128xf32>
    %9 = arith.addf %6, %8 : vector<16x128xf32>
    %cst_7 = arith.constant 5.000000e-01 : f32
    %10 = vector.broadcast %cst_7 : f32 to vector<16x128xf32>
    %11 = arith.mulf %10, %9 : vector<16x128xf32>
    %cst_8 = arith.constant 4.471500e-02 : f32
    %12 = vector.broadcast %cst_8 : f32 to vector<16x128xf32>
    %13 = arith.mulf %12, %9 : vector<16x128xf32>
    %14 = arith.mulf %13, %9 : vector<16x128xf32>
    %15 = arith.mulf %14, %9 : vector<16x128xf32>
    %16 = arith.addf %9, %15 : vector<16x128xf32>
    %cst_9 = arith.constant 0.797884583 : f32
    %17 = vector.broadcast %cst_9 : f32 to vector<16x128xf32>
    %18 = arith.mulf %17, %16 : vector<16x128xf32>
    %19 = math.tanh %18 : vector<16x128xf32>
    %cst_10 = arith.constant 1.000000e+00 : f32
    %20 = vector.broadcast %cst_10 : f32 to vector<16x128xf32>
    %21 = arith.addf %20, %19 : vector<16x128xf32>
    %22 = arith.mulf %11, %21 : vector<16x128xf32>
    %23 = arith.truncf %22 : vector<16x128xf32> to vector<16x128xbf16>
    %c0_11 = arith.constant 0 : index
    %c0_12 = arith.constant 0 : index
    %24 = vector.load %arg4[%c0_11, %c0_12] : memref<128x128xbf16, #tpu.memory_space<vmem>>, vector<128x128xbf16>
    %cst_13 = arith.constant dense<0.000000e+00> : vector<16x128xf32>
    %25 = tpu.matmul %23, %24, %cst_13 {dimension_numbers = #tpu.dot_dimension_numbers<[1], [0], [0], [1], [0, 0, 1, 1], [], []>} : vector<16x128xbf16>, vector<128x128xbf16>, vector<16x128xf32> -> vector<16x128xf32>
    %c0_14 = arith.constant 0 : index
    %c0_15 = arith.constant 0 : index
    %26 = vector.load %arg5[%c0_14, %c0_15] : memref<2x128xf32, #tpu.memory_space<vmem>>, vector<1x128xf32>
    %27 = vector.broadcast %26 : vector<1x128xf32> to vector<16x128xf32>
    %28 = arith.mulf %25, %27 : vector<16x128xf32>
    %c1_16 = arith.constant 1 : index
    %c0_17 = arith.constant 0 : index
    %29 = vector.load %arg5[%c1_16, %c0_17] : memref<2x128xf32, #tpu.memory_space<vmem>>, vector<1x128xf32>
    %30 = vector.broadcast %29 : vector<1x128xf32> to vector<16x128xf32>
    %31 = arith.addf %28, %30 : vector<16x128xf32>
    %cst_18 = arith.constant 5.000000e-01 : f32
    %32 = vector.broadcast %cst_18 : f32 to vector<16x128xf32>
    %33 = arith.mulf %32, %31 : vector<16x128xf32>
    %cst_19 = arith.constant 4.471500e-02 : f32
    %34 = vector.broadcast %cst_19 : f32 to vector<16x128xf32>
    %35 = arith.mulf %34, %31 : vector<16x128xf32>
    %36 = arith.mulf %35, %31 : vector<16x128xf32>
    %37 = arith.mulf %36, %31 : vector<16x128xf32>
    %38 = arith.addf %31, %37 : vector<16x128xf32>
    %cst_20 = arith.constant 0.797884583 : f32
    %39 = vector.broadcast %cst_20 : f32 to vector<16x128xf32>
    %40 = arith.mulf %39, %38 : vector<16x128xf32>
    %41 = math.tanh %40 : vector<16x128xf32>
    %cst_21 = arith.constant 1.000000e+00 : f32
    %42 = vector.broadcast %cst_21 : f32 to vector<16x128xf32>
    %43 = arith.addf %42, %41 : vector<16x128xf32>
    %44 = arith.mulf %33, %43 : vector<16x128xf32>
    %c0_22 = arith.constant 0 : index
    %c0_23 = arith.constant 0 : index
    %45 = vector.load %arg6[%c0_22, %c0_23] : memref<16x128xf32, #tpu.memory_space<vmem>>, vector<16x128xf32>
    tpu.vector_store %arg6[%c0_22, %c0_23], %44 {strides = array<i32>} : memref<16x128xf32, #tpu.memory_space<vmem>>, vector<16x128xf32>,
    return
  }
  func.func @transform_0(%arg0: i32) -> (i32, i32, i32) {
    %c0_i32 = arith.constant 0 : i32
    %c0_i32_0 = arith.constant 0 : i32
    %c0_i32_1 = arith.constant 0 : i32
    return %c0_i32, %arg0, %c0_i32_0 : i32, i32, i32
  }
  func.func @transform_1(%arg0: i32) -> (i32, i32) {
    %c0_i32 = arith.constant 0 : i32
    %c0_i32_0 = arith.constant 0 : i32
    %c0_i32_1 = arith.constant 0 : i32
    return %c0_i32, %c0_i32_0 : i32, i32
  }
  func.func @transform_2(%arg0: i32) -> (i32, i32) {
    %c0_i32 = arith.constant 0 : i32
    %c0_i32_0 = arith.constant 0 : i32
    %c0_i32_1 = arith.constant 0 : i32
    return %c0_i32, %c0_i32_0 : i32, i32
  }
  func.func @transform_3(%arg0: i32) -> (i32, i32) {
    %c0_i32 = arith.constant 0 : i32
    %c0_i32_0 = arith.constant 0 : i32
    %c0_i32_1 = arith.constant 0 : i32
    return %c0_i32, %c0_i32_0 : i32, i32
  }
  func.func @transform_4(%arg0: i32) -> (i32, i32) {
    %c0_i32 = arith.constant 0 : i32
    %c0_i32_0 = arith.constant 0 : i32
    %c0_i32_1 = arith.constant 0 : i32
    return %c0_i32, %c0_i32_0 : i32, i32
  }
  func.func @transform_5(%arg0: i32) -> (i32, i32) {
    %c0_i32 = arith.constant 0 : i32
    %c0_i32_0 = arith.constant 0 : i32
    return %arg0, %c0_i32 : i32, i32
  }
}

</mosaic_0001>

<bundles_post_ra>
// kernel: neg.9
= control target key start
LH: loop header
LB: loop body
LE: loop exit
PB: predicated region body
PF: predicated region fallthrough
CT: control target
= control target key end

     0   :  { %s24_s0 = inlined_call_operand.vmem [shape: f32[2,8], index: 0, kind: input, shape index: {}]   ;;  %s25_s1 = inlined_call_operand.vmem [shape: f32[2,8], index: 1, kind: output, shape index: {}]  }
   0x1   :  { %v2_v0 = vld [vmem:[%s24_s0] sm:$0x3] }
   0x2   :  { %v5_v1 = vxor.u32 2147483648, %v2_v0 }
   0x4   :  { %7 = vst [vmem:[%s25_s1] sm:$0x3] %v5_v1 }

// kernel: sparse_update_forward.11
= control target key start
LH: loop header
LB: loop body
LE: loop exit
PB: predicated region body
PF: predicated region fallthrough
CT: control target
= control target key end

     0   :  { %s599_s1 = inlined_call_operand.vmem [shape: bf16[128,128], index: 1, kind: input, shape index: {}]   ;;  %s600_s0 = inlined_call_operand.vmem [shape: bf16[2,16,128], index: 0, kind: input, shape index: {}]   ;;  %s601_s3 = inlined_call_operand.vmem [shape: bf16[128,128], index: 3, kind: input, shape index: {}]   ;;  %s602_s2 = inlined_call_operand.vmem [shape: f32[2,128], index: 2, kind: input, shape index: {}]   ;;  %s603_s4 = inlined_call_operand.vmem [shape: f32[2,128], index: 4, kind: input, shape index: {}]   ;;  %s604_s5 = inlined_call_operand.vmem [shape: f32[16,128], index: 5, kind: output, shape index: {}]  }
   0x1   :  { %v463_v0 = vld [vmem:[%s599_s1] sm:$0xff]   ;;  %v464_v1 = vld [vmem:[%s599_s1 + $0x8] sm:$0xff]   ;;  %v465_v2 = vld [vmem:[%s599_s1 + $0x10] sm:$0xff]  }
   0x2   :  { %423 = vmatprep.subr.bf16.mxu0 %v463_v0  ;;  %v466_v3 = vld [vmem:[%s599_s1 + $0x18] sm:$0xff]   ;;  %v471_v4 = vld [vmem:[%s600_s0] sm:$0xff]   ;;  %v468_v6 = vld [vmem:[%s599_s1 + $0x28] sm:$0xff]  }
   0x3   :  { %424 = vmatpush3.bf16.msra.mxu0 %v463_v0  ;;  %439 = vmatprep.mubr.bf16.mxu0 %v471_v4  ;;  %v467_v5 = vld [vmem:[%s599_s1 + $0x20] sm:$0xff]   ;;  %v469_v7 = vld [vmem:[%s599_s1 + $0x30] sm:$0xff]   ;;  %v470_v8 = vld [vmem:[%s599_s1 + $0x38] sm:$0xff]  }
   0x4   :  { %425 = vmatprep.subr.bf16.mxu0 %v464_v1  ;;  %v472_v9 = vld [vmem:[%s600_s0 + $0x8] sm:$0xff]   ;;  %v473_v10 = vld [vmem:[%s601_s3] sm:$0xff]   ;;  %v475_v12 = vld [vmem:[%s601_s3 + $0x10] sm:$0xff]  }
   0x5   :  { %443 = vmatprep.subr.bf16.mxu1 %v473_v10  ;;  %v474_v11 = vld [vmem:[%s601_s3 + $0x8] sm:$0xff]   ;;  %v476_v13 = vld [vmem:[%s601_s3 + $0x18] sm:$0xff]   ;;  %v477_v14 = vld [vmem:[%s601_s3 + $0x20] sm:$0xff]  }
   0x6   :  { %444 = vmatpush3.bf16.msra.mxu1 %v473_v10  ;;  %v478_v15 = vld [vmem:[%s601_s3 + $0x28] sm:$0xff]   ;;  %v479_v16 = vld [vmem:[%s601_s3 + $0x30] sm:$0xff]   ;;  %v480_v17 = vld [vmem:[%s601_s3 + $0x38] sm:$0xff]  }
   0x7   :  { %426 = vmatpush3.bf16.msra.mxu0 %v464_v1  ;;  %445 = vmatprep.subr.bf16.mxu1 %v474_v11  ;;  %v391_v18 = vld [vmem:[%s602_s2] ss:$0 sm:$0xff]  ;;  %v392_v20 = vld [vmem:[%s602_s2 + $0x1] ss:$0 sm:$0xff] }
   0x8   :  { %427 = vmatprep.subr.bf16.mxu0 %v465_v2 }
   0xa   :  { %446 = vmatpush3.bf16.msra.mxu1 %v474_v11 }
   0xb   :  { %428 = vmatpush3.bf16.msra.mxu0 %v465_v2  ;;  %447 = vmatprep.subr.bf16.mxu1 %v475_v12 }
   0xc   :  { %429 = vmatprep.subr.bf16.mxu0 %v466_v3 }
   0xe   :  { %448 = vmatpush3.bf16.msra.mxu1 %v475_v12 }
   0xf   :  { %430 = vmatpush3.bf16.msra.mxu0 %v466_v3  ;;  %449 = vmatprep.subr.bf16.mxu1 %v476_v13 }
  0x10   :  { %431 = vmatprep.subr.bf16.mxu0 %v467_v5 }
  0x12   :  { %450 = vmatpush3.bf16.msra.mxu1 %v476_v13 }
  0x13   :  { %432 = vmatpush3.bf16.msra.mxu0 %v467_v5  ;;  %451 = vmatprep.subr.bf16.mxu1 %v477_v14 }
  0x14   :  { %433 = vmatprep.subr.bf16.mxu0 %v468_v6 }
  0x16   :  { %452 = vmatpush3.bf16.msra.mxu1 %v477_v14 }
  0x17   :  { %434 = vmatpush3.bf16.msra.mxu0 %v468_v6  ;;  %453 = vmatprep.subr.bf16.mxu1 %v478_v15  ;;  %v401_v6 = vld [vmem:[%s603_s4] ss:$0 sm:$0xff] }
  0x18   :  { %435 = vmatprep.subr.bf16.mxu0 %v469_v7 }
  0x1a   :  { %454 = vmatpush3.bf16.msra.mxu1 %v478_v15 }
  0x1b   :  { %436 = vmatpush3.bf16.msra.mxu0 %v469_v7  ;;  %455 = vmatprep.subr.bf16.mxu1 %v479_v16 }
  0x1c   :  { %437 = vmatprep.subr.bf16.mxu0 %v470_v8 }
  0x1e   :  { %456 = vmatpush3.bf16.msra.mxu1 %v479_v16 }
  0x1f   :  { %438 = vmatpush3.bf16.msra.mxu0 %v470_v8  ;;  %457 = vmatprep.subr.bf16.mxu1 %v480_v17  ;;  %v402_v8 = vld [vmem:[%s603_s4 + $0x1] ss:$0 sm:$0xff] }
  0x22   :  { %440 = vmatmul.mubr.bf16.vlgmr.msra.gmra.mrb[0].mxu0 %v472_v9  ;;  %458 = vmatpush3.bf16.msra.mxu1 %v480_v17 }
  0xf5   :  { %v441_v19 = vpop.f32.mrb[0].mxu0 }
  0xf6   :  { %v157_v21 = vmul.f32 %v441_v19, %v391_v18  ;;  %v135_v22 = vpop.f32.mrb[1].mxu0 }
  0xf7   :  { %v155_v23 = vmul.f32 %v391_v18, %v135_v22  ;;  %v442_v24 = vpop.f32.mrb[2].mxu0 }
  0xf8   :  { %v166_v25 = vadd.f32 %v392_v20, %v157_v21  ;;  %v158_v26 = vmul.f32 %v442_v24, %v391_v18  ;;  %v138_v27 = vpop.f32.mrb[3].mxu0 }
  0xf9   :  { %v164_v28 = vadd.f32 %v392_v20, %v155_v23  ;;  %v156_v29 = vmul.f32 %v391_v18, %v138_v27 }
  0xfa   :  { %v174_v30 = vmul.f32 0.044715, %v166_v25  ;;  %v167_v31 = vadd.f32 %v392_v20, %v158_v26  ;;  %v170_v58 = vmul.f32 0.5, %v166_v25 }
  0xfb   :  { %v165_v32 = vadd.f32 %v392_v20, %v156_v29  ;;  %v172_v33 = vmul.f32 0.044715, %v164_v28  ;;  %v168_v61 = vmul.f32 0.5, %v164_v28 }
  0xfc   :  { %v178_v34 = vmul.f32 %v174_v30, %v166_v25  ;;  %v175_v35 = vmul.f32 0.044715, %v167_v31  ;;  %v171_v59 = vmul.f32 0.5, %v167_v31 }
  0xfd   :  { %v173_v36 = vmul.f32 0.044715, %v165_v32  ;;  %v176_v37 = vmul.f32 %v172_v33, %v164_v28  ;;  %v169_v62 = vmul.f32 0.5, %v165_v32 }
  0xfe   :  { %v179_v38 = vmul.f32 %v175_v35, %v167_v31  ;;  %v182_v39 = vmul.f32 %v178_v34, %v166_v25 }
  0xff   :  { %v177_v40 = vmul.f32 %v173_v36, %v165_v32  ;;  %v180_v41 = vmul.f32 %v176_v37, %v164_v28 }
 0x100   :  { %v183_v42 = vmul.f32 %v179_v38, %v167_v31  ;;  %v186_v43 = vadd.f32 %v182_v39, %v166_v25 }
 0x101   :  { %v181_v44 = vmul.f32 %v177_v40, %v165_v32  ;;  %v184_v45 = vadd.f32 %v180_v41, %v164_v28 }
 0x102   :  { %v187_v46 = vadd.f32 %v183_v42, %v167_v31  ;;  %v190_v47 = vmul.f32 0.7978846, %v186_v43 }
 0x103   :  { %v185_v48 = vadd.f32 %v181_v44, %v165_v32  ;;  %v188_v49 = vmul.f32 0.7978846, %v184_v45 }
 0x104   :  { %v191_v50 = vmul.f32 0.7978846, %v187_v46  ;;  %481 = vtanh.f32 %v190_v47 }
 0x105   :  { %v189_v51 = vmul.f32 0.7978846, %v185_v48  ;;  %483 = vtanh.f32 %v188_v49 }
 0x106   :  { %485 = vtanh.f32 %v191_v50 }
 0x107   :  { %487 = vtanh.f32 %v189_v51 }
 0x10e   :  { %v482_v52 = vpop.eup %481 }
 0x10f   :  { %v484_v53 = vpop.eup %483  ;;  %v198_v54 = vadd.f32 1.0, %v482_v52 }
 0x110   :  { %v486_v55 = vpop.eup %485  ;;  %v196_v56 = vadd.f32 1.0, %v484_v53 }
 0x111   :  { %v488_v57 = vpop.eup %487  ;;  %v199_v60 = vadd.f32 1.0, %v486_v55  ;;  %v202_v0 = vmul.f32 %v198_v54, %v170_v58 }
 0x112   :  { %v197_v63 = vadd.f32 1.0, %v488_v57  ;;  %v200_v2 = vmul.f32 %v196_v56, %v168_v61 }
 0x113   :  { %v203_v1 = vmul.f32 %v199_v60, %v171_v59 }
 0x114   :  { %v201_v3 = vmul.f32 %v197_v63, %v169_v62 }
 0x115   :  { %v205_v4 = vpack.c.bf16 %v203_v1, %v202_v0 }
 0x116   :  { %v204_v5 = vpack.c.bf16 %v201_v3, %v200_v2 }
 0x118   :  { %459 = vmatprep.mubr.bf16.mxu1 %v204_v5 }
 0x119   :  { %460 = vmatmul.mubr.bf16.vlgmr.msra.gmra.mrb[0].mxu1 %v205_v4 }
 0x1ec   :  { %v461_v7 = vpop.f32.mrb[0].mxu1 }
 0x1ed   :  { %v326_v9 = vmul.f32 %v461_v7, %v401_v6  ;;  %v304_v10 = vpop.f32.mrb[1].mxu1 }
 0x1ee   :  { %v324_v11 = vmul.f32 %v401_v6, %v304_v10  ;;  %v462_v12 = vpop.f32.mrb[2].mxu1 }
 0x1ef   :  { %v335_v13 = vadd.f32 %v402_v8, %v326_v9  ;;  %v327_v14 = vmul.f32 %v462_v12, %v401_v6  ;;  %v307_v15 = vpop.f32.mrb[3].mxu1 }
 0x1f0   :  { %v333_v16 = vadd.f32 %v402_v8, %v324_v11  ;;  %v325_v17 = vmul.f32 %v401_v6, %v307_v15 }
 0x1f1   :  { %v343_v18 = vmul.f32 0.044715, %v335_v13  ;;  %v336_v19 = vadd.f32 %v402_v8, %v327_v14  ;;  %v339_v42 = vmul.f32 0.5, %v335_v13 }
 0x1f2   :  { %v341_v20 = vmul.f32 0.044715, %v333_v16  ;;  %v334_v21 = vadd.f32 %v402_v8, %v325_v17  ;;  %v337_v45 = vmul.f32 0.5, %v333_v16 }
 0x1f3   :  { %v347_v22 = vmul.f32 %v343_v18, %v335_v13  ;;  %v344_v23 = vmul.f32 0.044715, %v336_v19  ;;  %v340_v49 = vmul.f32 0.5, %v336_v19 }
 0x1f4   :  { %v345_v24 = vmul.f32 %v341_v20, %v333_v16  ;;  %v342_v25 = vmul.f32 0.044715, %v334_v21  ;;  %v338_v52 = vmul.f32 0.5, %v334_v21 }
 0x1f5   :  { %v351_v26 = vmul.f32 %v347_v22, %v335_v13  ;;  %v348_v27 = vmul.f32 %v344_v23, %v336_v19 }
 0x1f6   :  { %v349_v28 = vmul.f32 %v345_v24, %v333_v16  ;;  %v346_v29 = vmul.f32 %v342_v25, %v334_v21 }
 0x1f7   :  { %v355_v30 = vadd.f32 %v351_v26, %v335_v13  ;;  %v352_v31 = vmul.f32 %v348_v27, %v336_v19 }
 0x1f8   :  { %v353_v32 = vadd.f32 %v349_v28, %v333_v16  ;;  %v350_v33 = vmul.f32 %v346_v29, %v334_v21 }
 0x1f9   :  { %v359_v34 = vmul.f32 0.7978846, %v355_v30  ;;  %v356_v35 = vadd.f32 %v352_v31, %v336_v19 }
 0x1fa   :  { %v357_v36 = vmul.f32 0.7978846, %v353_v32  ;;  %v354_v37 = vadd.f32 %v350_v33, %v334_v21 }
 0x1fb   :  { %489 = vtanh.f32 %v359_v34  ;;  %v360_v38 = vmul.f32 0.7978846, %v356_v35 }
 0x1fc   :  { %491 = vtanh.f32 %v357_v36  ;;  %v358_v39 = vmul.f32 0.7978846, %v354_v37 }
 0x1fd   :  { %493 = vtanh.f32 %v360_v38 }
 0x1fe   :  { %495 = vtanh.f32 %v358_v39 }
 0x205   :  { %v490_v40 = vpop.eup %489 }
 0x206   :  { %v492_v41 = vpop.eup %491  ;;  %v367_v43 = vadd.f32 1.0, %v490_v40 }
 0x207   :  { %v494_v44 = vpop.eup %493  ;;  %v365_v46 = vadd.f32 1.0, %v492_v41 }
 0x208   :  { %v496_v47 = vpop.eup %495  ;;  %v371_v48 = vmul.f32 %v367_v43, %v339_v42  ;;  %v368_v50 = vadd.f32 1.0, %v494_v44 }
 0x209   :  { %v369_v51 = vmul.f32 %v365_v46, %v337_v45  ;;  %v366_v53 = vadd.f32 1.0, %v496_v47 }
 0x20a   :  { %v372_v54 = vmul.f32 %v368_v50, %v340_v49 }
 0x20b   :  { %v373_v55 = vmax.f32 %v369_v51, %v371_v48  ;;  %v370_v56 = vmul.f32 %v366_v53, %v338_v52 }
 0x20d   :  { %375 = vst [vmem:[%s604_s5] sm:$0xff] %v373_v55  ;;  %v374_v57 = vmax.f32 %v370_v56, %v372_v54 }
 0x20f   :  { %376 = vst [vmem:[%s604_s5 + $0x8] sm:$0xff] %v374_v57 }

// kernel: sparse_update_forward.9
= control target key start
LH: loop header
LB: loop body
LE: loop exit
PB: predicated region body
PF: predicated region fallthrough
CT: control target
= control target key end

     0   :  { %s270_s1 = inlined_call_operand.vmem [shape: bf16[128,128], index: 1, kind: input, shape index: {}]   ;;  %s271_s0 = inlined_call_operand.vmem [shape: bf16[2,16,128], index: 0, kind: input, shape index: {}]   ;;  %s272_s2 = inlined_call_operand.vmem [shape: f32[1,2,128], index: 2, kind: output, shape index: {}]  }
   0x1   :  { %v209_v0 = vld [vmem:[%s270_s1] sm:$0xff]   ;;  %v210_v1 = vld [vmem:[%s270_s1 + $0x8] sm:$0xff]   ;;  %v211_v2 = vld [vmem:[%s270_s1 + $0x10] sm:$0xff]  }
   0x2   :  { %189 = vmatprep.subr.bf16.mxu0 %v209_v0  ;;  %v212_v3 = vld [vmem:[%s270_s1 + $0x18] sm:$0xff]   ;;  %v217_v4 = vld [vmem:[%s271_s0] sm:$0xff]   ;;  %v214_v6 = vld [vmem:[%s270_s1 + $0x28] sm:$0xff]  }
   0x3   :  { %190 = vmatpush3.bf16.msra.mxu0 %v209_v0  ;;  %205 = vmatprep.mubr.bf16.mxu0 %v217_v4  ;;  %v213_v5 = vld [vmem:[%s270_s1 + $0x20] sm:$0xff]   ;;  %v215_v7 = vld [vmem:[%s270_s1 + $0x30] sm:$0xff]   ;;  %v216_v8 = vld [vmem:[%s270_s1 + $0x38] sm:$0xff]  }
   0x4   :  { %191 = vmatprep.subr.bf16.mxu0 %v210_v1  ;;  %v218_v9 = vld [vmem:[%s271_s0 + $0x8] sm:$0xff]  }
   0x7   :  { %192 = vmatpush3.bf16.msra.mxu0 %v210_v1 }
   0x8   :  { %193 = vmatprep.subr.bf16.mxu0 %v211_v2 }
   0xb   :  { %194 = vmatpush3.bf16.msra.mxu0 %v211_v2 }
   0xc   :  { %195 = vmatprep.subr.bf16.mxu0 %v212_v3 }
   0xf   :  { %196 = vmatpush3.bf16.msra.mxu0 %v212_v3 }
  0x10   :  { %197 = vmatprep.subr.bf16.mxu0 %v213_v5 }
  0x13   :  { %198 = vmatpush3.bf16.msra.mxu0 %v213_v5 }
  0x14   :  { %199 = vmatprep.subr.bf16.mxu0 %v214_v6 }
  0x17   :  { %200 = vmatpush3.bf16.msra.mxu0 %v214_v6 }
  0x18   :  { %201 = vmatprep.subr.bf16.mxu0 %v215_v7 }
  0x1b   :  { %202 = vmatpush3.bf16.msra.mxu0 %v215_v7 }
  0x1c   :  { %203 = vmatprep.subr.bf16.mxu0 %v216_v8 }
  0x1f   :  { %204 = vmatpush3.bf16.msra.mxu0 %v216_v8 }
  0x22   :  { %206 = vmatmul.mubr.bf16.vlgmr.msra.gmra.mrb[0].mxu0 %v218_v9 }
  0xf5   :  { %v207_v10 = vpop.f32.mrb[0].mxu0 }
  0xf6   :  { %v126_v11 = vpop.f32.mrb[1].mxu0  ;;  %v153_v17 = vmul.f32 %v207_v10, %v207_v10 }
  0xf7   :  { %v208_v12 = vpop.f32.mrb[2].mxu0  ;;  %v151_v14 = vmul.f32 %v126_v11, %v126_v11 }
  0xf8   :  { %v129_v13 = vpop.f32.mrb[3].mxu0  ;;  %v154_v20 = vmul.f32 %v208_v12, %v208_v12 }
  0xf9   :  { %v141_v15 = vadd.f32 %v129_v13, %v126_v11  ;;  %v152_v16 = vmul.f32 %v129_v13, %v129_v13 }
  0xfb   :  { %v142_v18 = vadd.f32 %v207_v10, %v141_v15  ;;  %v155_v19 = vadd.f32 %v152_v16, %v151_v14 }
  0xfd   :  { %v143_v21 = vadd.f32 %v208_v12, %v142_v18  ;;  %v156_v22 = vadd.f32 %v155_v19, %v153_v17 }
  0xff   :  { %v144_v23 = vrot.slane %v143_v21, 4  ;;  %v157_v24 = vadd.f32 %v156_v22, %v154_v20 }
 0x101   :  { %v145_v25 = vadd.f32 %v144_v23, %v143_v21  ;;  %v158_v26 = vrot.slane %v157_v24, 4 }
 0x103   :  { %v146_v27 = vrot.slane %v145_v25, 2  ;;  %v159_v28 = vadd.f32 %v158_v26, %v157_v24 }
 0x105   :  { %v147_v29 = vadd.f32 %v146_v27, %v145_v25  ;;  %v160_v30 = vrot.slane %v159_v28, 2 }
 0x107   :  { %v148_v31 = vrot.slane %v147_v29, 1  ;;  %v161_v32 = vadd.f32 %v160_v30, %v159_v28 }
 0x109   :  { %v149_v33 = vadd.f32 %v148_v31, %v147_v29  ;;  %v162_v34 = vrot.slane %v161_v32, 1 }
 0x10b   :  { %150 = vst [vmem:[%s272_s2] sm:$0x1] %v149_v33  ;;  %v163_v35 = vadd.f32 %v162_v34, %v161_v32 }
 0x10d   :  { %164 = vst [vmem:[%s272_s2 + $0x1] sm:$0x1] %v163_v35 }

// kernel: sparse_update_forward.10
= control target key start
LH: loop header
LB: loop body
LE: loop exit
PB: predicated region body
PF: predicated region fallthrough
CT: control target
= control target key end

     0   :  { %s541_s1 = inlined_call_operand.vmem [shape: bf16[128,128], index: 1, kind: input, shape index: {}]   ;;  %s542_s0 = inlined_call_operand.vmem [shape: bf16[2,16,128], index: 0, kind: input, shape index: {}]   ;;  %s543_s3 = inlined_call_operand.vmem [shape: bf16[128,128], index: 3, kind: input, shape index: {}]   ;;  %s544_s2 = inlined_call_operand.vmem [shape: f32[2,128], index: 2, kind: input, shape index: {}]   ;;  %s545_s4 = inlined_call_operand.vmem [shape: f32[1,2,128], index: 4, kind: output, shape index: {}]  }
   0x1   :  { %v424_v0 = vld [vmem:[%s541_s1] sm:$0xff]   ;;  %v425_v1 = vld [vmem:[%s541_s1 + $0x8] sm:$0xff]   ;;  %v426_v2 = vld [vmem:[%s541_s1 + $0x10] sm:$0xff]  }
   0x2   :  { %384 = vmatprep.subr.bf16.mxu0 %v424_v0  ;;  %v427_v3 = vld [vmem:[%s541_s1 + $0x18] sm:$0xff]   ;;  %v432_v4 = vld [vmem:[%s542_s0] sm:$0xff]   ;;  %v429_v6 = vld [vmem:[%s541_s1 + $0x28] sm:$0xff]  }
   0x3   :  { %385 = vmatpush3.bf16.msra.mxu0 %v424_v0  ;;  %400 = vmatprep.mubr.bf16.mxu0 %v432_v4  ;;  %v428_v5 = vld [vmem:[%s541_s1 + $0x20] sm:$0xff]   ;;  %v430_v7 = vld [vmem:[%s541_s1 + $0x30] sm:$0xff]   ;;  %v431_v8 = vld [vmem:[%s541_s1 + $0x38] sm:$0xff]  }
   0x4   :  { %386 = vmatprep.subr.bf16.mxu0 %v425_v1  ;;  %v433_v9 = vld [vmem:[%s542_s0 + $0x8] sm:$0xff]   ;;  %v434_v10 = vld [vmem:[%s543_s3] sm:$0xff]   ;;  %v436_v12 = vld [vmem:[%s543_s3 + $0x10] sm:$0xff]  }
   0x5   :  { %404 = vmatprep.subr.bf16.mxu1 %v434_v10  ;;  %v435_v11 = vld [vmem:[%s543_s3 + $0x8] sm:$0xff]   ;;  %v437_v13 = vld [vmem:[%s543_s3 + $0x18] sm:$0xff]   ;;  %v438_v14 = vld [vmem:[%s543_s3 + $0x20] sm:$0xff]  }
   0x6   :  { %405 = vmatpush3.bf16.msra.mxu1 %v434_v10  ;;  %v439_v15 = vld [vmem:[%s543_s3 + $0x28] sm:$0xff]   ;;  %v440_v16 = vld [vmem:[%s543_s3 + $0x30] sm:$0xff]   ;;  %v441_v17 = vld [vmem:[%s543_s3 + $0x38] sm:$0xff]  }
   0x7   :  { %387 = vmatpush3.bf16.msra.mxu0 %v425_v1  ;;  %406 = vmatprep.subr.bf16.mxu1 %v435_v11  ;;  %v354_v18 = vld [vmem:[%s544_s2] ss:$0 sm:$0xff]  ;;  %v355_v20 = vld [vmem:[%s544_s2 + $0x1] ss:$0 sm:$0xff] }
   0x8   :  { %388 = vmatprep.subr.bf16.mxu0 %v426_v2 }
   0xa   :  { %407 = vmatpush3.bf16.msra.mxu1 %v435_v11 }
   0xb   :  { %389 = vmatpush3.bf16.msra.mxu0 %v426_v2  ;;  %408 = vmatprep.subr.bf16.mxu1 %v436_v12 }
   0xc   :  { %390 = vmatprep.subr.bf16.mxu0 %v427_v3 }
   0xe   :  { %409 = vmatpush3.bf16.msra.mxu1 %v436_v12 }
   0xf   :  { %391 = vmatpush3.bf16.msra.mxu0 %v427_v3  ;;  %410 = vmatprep.subr.bf16.mxu1 %v437_v13 }
  0x10   :  { %392 = vmatprep.subr.bf16.mxu0 %v428_v5 }
  0x12   :  { %411 = vmatpush3.bf16.msra.mxu1 %v437_v13 }
  0x13   :  { %393 = vmatpush3.bf16.msra.mxu0 %v428_v5  ;;  %412 = vmatprep.subr.bf16.mxu1 %v438_v14 }
  0x14   :  { %394 = vmatprep.subr.bf16.mxu0 %v429_v6 }
  0x16   :  { %413 = vmatpush3.bf16.msra.mxu1 %v438_v14 }
  0x17   :  { %395 = vmatpush3.bf16.msra.mxu0 %v429_v6  ;;  %414 = vmatprep.subr.bf16.mxu1 %v439_v15 }
  0x18   :  { %396 = vmatprep.subr.bf16.mxu0 %v430_v7 }
  0x1a   :  { %415 = vmatpush3.bf16.msra.mxu1 %v439_v15 }
  0x1b   :  { %397 = vmatpush3.bf16.msra.mxu0 %v430_v7  ;;  %416 = vmatprep.subr.bf16.mxu1 %v440_v16 }
  0x1c   :  { %398 = vmatprep.subr.bf16.mxu0 %v431_v8 }
  0x1e   :  { %417 = vmatpush3.bf16.msra.mxu1 %v440_v16 }
  0x1f   :  { %399 = vmatpush3.bf16.msra.mxu0 %v431_v8  ;;  %418 = vmatprep.subr.bf16.mxu1 %v441_v17 }
  0x22   :  { %401 = vmatmul.mubr.bf16.vlgmr.msra.gmra.mrb[0].mxu0 %v433_v9  ;;  %419 = vmatpush3.bf16.msra.mxu1 %v441_v17 }
  0xf5   :  { %v402_v19 = vpop.f32.mrb[0].mxu0 }
  0xf6   :  { %v154_v21 = vmul.f32 %v402_v19, %v354_v18  ;;  %v132_v22 = vpop.f32.mrb[1].mxu0 }
  0xf7   :  { %v152_v23 = vmul.f32 %v354_v18, %v132_v22  ;;  %v403_v24 = vpop.f32.mrb[2].mxu0 }
  0xf8   :  { %v163_v25 = vadd.f32 %v355_v20, %v154_v21  ;;  %v155_v26 = vmul.f32 %v403_v24, %v354_v18  ;;  %v135_v27 = vpop.f32.mrb[3].mxu0 }
  0xf9   :  { %v161_v28 = vadd.f32 %v355_v20, %v152_v23  ;;  %v153_v29 = vmul.f32 %v354_v18, %v135_v27 }
  0xfa   :  { %v171_v30 = vmul.f32 0.044715, %v163_v25  ;;  %v164_v31 = vadd.f32 %v355_v20, %v155_v26  ;;  %v167_v58 = vmul.f32 0.5, %v163_v25 }
  0xfb   :  { %v162_v32 = vadd.f32 %v355_v20, %v153_v29  ;;  %v169_v33 = vmul.f32 0.044715, %v161_v28  ;;  %v165_v61 = vmul.f32 0.5, %v161_v28 }
  0xfc   :  { %v175_v34 = vmul.f32 %v171_v30, %v163_v25  ;;  %v172_v35 = vmul.f32 0.044715, %v164_v31  ;;  %v168_v59 = vmul.f32 0.5, %v164_v31 }
  0xfd   :  { %v170_v36 = vmul.f32 0.044715, %v162_v32  ;;  %v173_v37 = vmul.f32 %v169_v33, %v161_v28  ;;  %v166_v62 = vmul.f32 0.5, %v162_v32 }
  0xfe   :  { %v176_v38 = vmul.f32 %v172_v35, %v164_v31  ;;  %v179_v39 = vmul.f32 %v175_v34, %v163_v25 }
  0xff   :  { %v174_v40 = vmul.f32 %v170_v36, %v162_v32  ;;  %v177_v41 = vmul.f32 %v173_v37, %v161_v28 }
 0x100   :  { %v180_v42 = vmul.f32 %v176_v38, %v164_v31  ;;  %v183_v43 = vadd.f32 %v179_v39, %v163_v25 }
 0x101   :  { %v178_v44 = vmul.f32 %v174_v40, %v162_v32  ;;  %v181_v45 = vadd.f32 %v177_v41, %v161_v28 }
 0x102   :  { %v184_v46 = vadd.f32 %v180_v42, %v164_v31  ;;  %v187_v47 = vmul.f32 0.7978846, %v183_v43 }
 0x103   :  { %v182_v48 = vadd.f32 %v178_v44, %v162_v32  ;;  %v185_v49 = vmul.f32 0.7978846, %v181_v45 }
 0x104   :  { %v188_v50 = vmul.f32 0.7978846, %v184_v46  ;;  %442 = vtanh.f32 %v187_v47 }
 0x105   :  { %v186_v51 = vmul.f32 0.7978846, %v182_v48  ;;  %444 = vtanh.f32 %v185_v49 }
 0x106   :  { %446 = vtanh.f32 %v188_v50 }
 0x107   :  { %448 = vtanh.f32 %v186_v51 }
 0x10e   :  { %v443_v52 = vpop.eup %442 }
 0x10f   :  { %v445_v53 = vpop.eup %444  ;;  %v195_v54 = vadd.f32 1.0, %v443_v52 }
 0x110   :  { %v447_v55 = vpop.eup %446  ;;  %v193_v56 = vadd.f32 1.0, %v445_v53 }
 0x111   :  { %v449_v57 = vpop.eup %448  ;;  %v196_v60 = vadd.f32 1.0, %v447_v55  ;;  %v199_v0 = vmul.f32 %v195_v54, %v167_v58 }
 0x112   :  { %v194_v63 = vadd.f32 1.0, %v449_v57  ;;  %v197_v2 = vmul.f32 %v193_v56, %v165_v61 }
 0x113   :  { %v200_v1 = vmul.f32 %v196_v60, %v168_v59 }
 0x114   :  { %v198_v3 = vmul.f32 %v194_v63, %v166_v62 }
 0x115   :  { %v202_v4 = vpack.c.bf16 %v200_v1, %v199_v0 }
 0x116   :  { %v201_v5 = vpack.c.bf16 %v198_v3, %v197_v2 }
 0x118   :  { %420 = vmatprep.mubr.bf16.mxu1 %v201_v5 }
 0x119   :  { %421 = vmatmul.mubr.bf16.vlgmr.msra.gmra.mrb[0].mxu1 %v202_v4 }
 0x1ec   :  { %v422_v6 = vpop.f32.mrb[0].mxu1 }
 0x1ed   :  { %v301_v7 = vpop.f32.mrb[1].mxu1  ;;  %v328_v13 = vmul.f32 %v422_v6, %v422_v6 }
 0x1ee   :  { %v423_v8 = vpop.f32.mrb[2].mxu1  ;;  %v326_v10 = vmul.f32 %v301_v7, %v301_v7 }
 0x1ef   :  { %v304_v9 = vpop.f32.mrb[3].mxu1  ;;  %v329_v16 = vmul.f32 %v423_v8, %v423_v8 }
 0x1f0   :  { %v316_v11 = vadd.f32 %v304_v9, %v301_v7  ;;  %v327_v12 = vmul.f32 %v304_v9, %v304_v9 }
 0x1f2   :  { %v317_v14 = vadd.f32 %v422_v6, %v316_v11  ;;  %v330_v15 = vadd.f32 %v327_v12, %v326_v10 }
 0x1f4   :  { %v318_v17 = vadd.f32 %v423_v8, %v317_v14  ;;  %v331_v18 = vadd.f32 %v330_v15, %v328_v13 }
 0x1f6   :  { %v319_v19 = vrot.slane %v318_v17, 4  ;;  %v332_v20 = vadd.f32 %v331_v18, %v329_v16 }
 0x1f8   :  { %v320_v21 = vadd.f32 %v319_v19, %v318_v17  ;;  %v333_v22 = vrot.slane %v332_v20, 4 }
 0x1fa   :  { %v321_v23 = vrot.slane %v320_v21, 2  ;;  %v334_v24 = vadd.f32 %v333_v22, %v332_v20 }
 0x1fc   :  { %v322_v25 = vadd.f32 %v321_v23, %v320_v21  ;;  %v335_v26 = vrot.slane %v334_v24, 2 }
 0x1fe   :  { %v323_v27 = vrot.slane %v322_v25, 1  ;;  %v336_v28 = vadd.f32 %v335_v26, %v334_v24 }
 0x200   :  { %v324_v29 = vadd.f32 %v323_v27, %v322_v25  ;;  %v337_v30 = vrot.slane %v336_v28, 1 }
 0x202   :  { %325 = vst [vmem:[%s545_s4] sm:$0x1] %v324_v29  ;;  %v338_v31 = vadd.f32 %v337_v30, %v336_v28 }
 0x204   :  { %339 = vst [vmem:[%s545_s4 + $0x1] sm:$0x1] %v338_v31 }

// kernel: sparse_update_forward.15
= control target key start
LH: loop header
LB: loop body
LE: loop exit
PB: predicated region body
PF: predicated region fallthrough
CT: control target
= control target key end

     0   :  { %v196_v0 = vmov 0.0   ;;  %vm197_vm0 = vmmov 0   ;;  %s246_s1 = inlined_call_operand.vmem [shape: bf16[128,128], index: 1, kind: input, shape index: {}]   ;;  %s247_s0 = inlined_call_operand.vmem [shape: bf16[1,16,128], index: 0, kind: input, shape index: {}]   ;;  %s248_s2 = inlined_call_operand.vmem [shape: f32[1,2,128], index: 2, kind: output, shape index: {}]  }
   0x1   :  { %165 = vmatprep.subr.bf16.mxu0 %v196_v0  ;;  %v187_v1 = vld [vmem:[%s246_s1] sm:$0xff]   ;;  %181 = vmatprep.mubr.msk.bf16.mxu0 %vm197_vm0, %v196_v0  ;;  %v188_v2 = vld [vmem:[%s246_s1 + $0x8] sm:$0xff]   ;;  %v189_v3 = vld [vmem:[%s246_s1 + $0x10] sm:$0xff]  }
   0x2   :  { %166 = vmatpush3.bf16.msra.mxu0 %v187_v1  ;;  %v190_v4 = vld [vmem:[%s246_s1 + $0x18] sm:$0xff]   ;;  %v191_v5 = vld [vmem:[%s246_s1 + $0x20] sm:$0xff]   ;;  %v192_v6 = vld [vmem:[%s246_s1 + $0x28] sm:$0xff]  }
   0x3   :  { %167 = vmatprep.subr.bf16.mxu0 %v196_v0  ;;  %v193_v7 = vld [vmem:[%s246_s1 + $0x30] sm:$0xff]   ;;  %v194_v8 = vld [vmem:[%s246_s1 + $0x38] sm:$0xff]   ;;  %v195_v9 = vld [vmem:[%s247_s0] sm:$0xff]  }
   0x6   :  { %168 = vmatpush3.bf16.msra.mxu0 %v188_v2 }
   0x7   :  { %169 = vmatprep.subr.bf16.mxu0 %v196_v0 }
   0xa   :  { %170 = vmatpush3.bf16.msra.mxu0 %v189_v3 }
   0xb   :  { %171 = vmatprep.subr.bf16.mxu0 %v196_v0 }
   0xe   :  { %172 = vmatpush3.bf16.msra.mxu0 %v190_v4 }
   0xf   :  { %173 = vmatprep.subr.bf16.mxu0 %v196_v0 }
  0x12   :  { %174 = vmatpush3.bf16.msra.mxu0 %v191_v5 }
  0x13   :  { %175 = vmatprep.subr.bf16.mxu0 %v196_v0 }
  0x16   :  { %176 = vmatpush3.bf16.msra.mxu0 %v192_v6 }
  0x17   :  { %177 = vmatprep.subr.bf16.mxu0 %v196_v0 }
  0x1a   :  { %178 = vmatpush3.bf16.msra.mxu0 %v193_v7 }
  0x1b   :  { %179 = vmatprep.subr.bf16.mxu0 %v196_v0 }
  0x1e   :  { %180 = vmatpush3.bf16.msra.mxu0 %v194_v8 }
  0x21   :  { %182 = vmatmul.mubr.bf16.vlgmr.msra.gmra.mrb[0].mxu0 %v195_v9 }
  0xf4   :  { %v118_v10 = vpop.f32.mrb[0].mxu0 }
  0xf5   :  { %v183_v11 = vpop.f32.mrb[1].mxu0  ;;  %v133_v13 = vmul.f32 %v118_v10, %v118_v10 }
  0xf6   :  { %v121_v12 = vpop.f32.mrb[2].mxu0 }
  0xf7   :  { %v125_v14 = vadd.f32 %v121_v12, %v118_v10  ;;  %v134_v15 = vmul.f32 %v121_v12, %v121_v12  ;;  %v184_v16 = vpop.f32.mrb[3].mxu0 }
  0xf9   :  { %v126_v17 = vrot.slane %v125_v14, 4  ;;  %v135_v18 = vadd.f32 %v134_v15, %v133_v13 }
  0xfb   :  { %v127_v19 = vadd.f32 %v126_v17, %v125_v14  ;;  %v136_v20 = vrot.slane %v135_v18, 4 }
  0xfd   :  { %v128_v21 = vrot.slane %v127_v19, 2  ;;  %v137_v22 = vadd.f32 %v136_v20, %v135_v18 }
  0xff   :  { %v129_v23 = vadd.f32 %v128_v21, %v127_v19  ;;  %v138_v24 = vrot.slane %v137_v22, 2 }
 0x101   :  { %v130_v25 = vrot.slane %v129_v23, 1  ;;  %v139_v26 = vadd.f32 %v138_v24, %v137_v22 }
 0x103   :  { %v131_v27 = vadd.f32 %v130_v25, %v129_v23  ;;  %v140_v28 = vrot.slane %v139_v26, 1 }
 0x105   :  { %132 = vst [vmem:[%s248_s2] sm:$0x1] %v131_v27  ;;  %v141_v29 = vadd.f32 %v140_v28, %v139_v26 }
 0x107   :  { %142 = vst [vmem:[%s248_s2 + $0x1] sm:$0x1] %v141_v29 }

// kernel: sparse_update_forward.16
= control target key start
LH: loop header
LB: loop body
LE: loop exit
PB: predicated region body
PF: predicated region fallthrough
CT: control target
= control target key end

     0   :  { %v391_v0 = vmov 0.0   ;;  %vm392_vm0 = vmmov 0   ;;  %s481_s1 = inlined_call_operand.vmem [shape: bf16[128,128], index: 1, kind: input, shape index: {}]   ;;  %s482_s0 = inlined_call_operand.vmem [shape: bf16[1,16,128], index: 0, kind: input, shape index: {}]   ;;  %s483_s3 = inlined_call_operand.vmem [shape: bf16[128,128], index: 3, kind: input, shape index: {}]   ;;  %s484_s2 = inlined_call_operand.vmem [shape: f32[2,128], index: 2, kind: input, shape index: {}]   ;;  %s485_s4 = inlined_call_operand.vmem [shape: f32[1,2,128], index: 4, kind: output, shape index: {}]  }
   0x1   :  { %328 = vmatprep.subr.bf16.mxu0 %v391_v0  ;;  %v370_v1 = vld [vmem:[%s481_s1] sm:$0xff]   ;;  %344 = vmatprep.mubr.msk.bf16.mxu0 %vm392_vm0, %v391_v0  ;;  %v371_v2 = vld [vmem:[%s481_s1 + $0x8] sm:$0xff]   ;;  %v372_v3 = vld [vmem:[%s481_s1 + $0x10] sm:$0xff]  }
   0x2   :  { %348 = vmatprep.subr.bf16.mxu1 %v391_v0  ;;  %364 = vmatprep.mubr.msk.bf16.mxu1 %vm392_vm0, %v391_v0  ;;  %v373_v4 = vld [vmem:[%s481_s1 + $0x18] sm:$0xff]   ;;  %v374_v5 = vld [vmem:[%s481_s1 + $0x20] sm:$0xff]   ;;  %v375_v6 = vld [vmem:[%s481_s1 + $0x28] sm:$0xff]  }
   0x3   :  { %329 = vmatpush3.bf16.msra.mxu0 %v370_v1  ;;  %v376_v7 = vld [vmem:[%s481_s1 + $0x30] sm:$0xff]   ;;  %v377_v8 = vld [vmem:[%s481_s1 + $0x38] sm:$0xff]   ;;  %v378_v9 = vld [vmem:[%s482_s0] sm:$0xff]  }
   0x4   :  { %330 = vmatprep.subr.bf16.mxu0 %v391_v0  ;;  %v379_v10 = vld [vmem:[%s483_s3] sm:$0xff]   ;;  %v380_v11 = vld [vmem:[%s483_s3 + $0x8] sm:$0xff]   ;;  %v381_v12 = vld [vmem:[%s483_s3 + $0x10] sm:$0xff]  }
   0x5   :  { %349 = vmatpush3.bf16.msra.mxu1 %v379_v10  ;;  %v382_v13 = vld [vmem:[%s483_s3 + $0x18] sm:$0xff]   ;;  %v383_v14 = vld [vmem:[%s483_s3 + $0x20] sm:$0xff]   ;;  %v384_v15 = vld [vmem:[%s483_s3 + $0x28] sm:$0xff]  }
   0x6   :  { %350 = vmatprep.subr.bf16.mxu1 %v391_v0  ;;  %v385_v16 = vld [vmem:[%s483_s3 + $0x30] sm:$0xff]   ;;  %v386_v17 = vld [vmem:[%s483_s3 + $0x38] sm:$0xff]   ;;  %v300_v18 = vld [vmem:[%s484_s2] ss:$0 sm:$0xff] }
   0x7   :  { %331 = vmatpush3.bf16.msra.mxu0 %v371_v2  ;;  %v301_v20 = vld [vmem:[%s484_s2 + $0x1] ss:$0 sm:$0xff] }
   0x8   :  { %332 = vmatprep.subr.bf16.mxu0 %v391_v0 }
   0x9   :  { %351 = vmatpush3.bf16.msra.mxu1 %v380_v11 }
   0xa   :  { %352 = vmatprep.subr.bf16.mxu1 %v391_v0 }
   0xb   :  { %333 = vmatpush3.bf16.msra.mxu0 %v372_v3 }
   0xc   :  { %334 = vmatprep.subr.bf16.mxu0 %v391_v0 }
   0xd   :  { %353 = vmatpush3.bf16.msra.mxu1 %v381_v12 }
   0xe   :  { %354 = vmatprep.subr.bf16.mxu1 %v391_v0 }
   0xf   :  { %335 = vmatpush3.bf16.msra.mxu0 %v373_v4 }
  0x10   :  { %336 = vmatprep.subr.bf16.mxu0 %v391_v0 }
  0x11   :  { %355 = vmatpush3.bf16.msra.mxu1 %v382_v13 }
  0x12   :  { %356 = vmatprep.subr.bf16.mxu1 %v391_v0 }
  0x13   :  { %337 = vmatpush3.bf16.msra.mxu0 %v374_v5 }
  0x14   :  { %338 = vmatprep.subr.bf16.mxu0 %v391_v0 }
  0x15   :  { %357 = vmatpush3.bf16.msra.mxu1 %v383_v14 }
  0x16   :  { %358 = vmatprep.subr.bf16.mxu1 %v391_v0 }
  0x17   :  { %339 = vmatpush3.bf16.msra.mxu0 %v375_v6 }
  0x18   :  { %340 = vmatprep.subr.bf16.mxu0 %v391_v0 }
  0x19   :  { %359 = vmatpush3.bf16.msra.mxu1 %v384_v15 }
  0x1a   :  { %360 = vmatprep.subr.bf16.mxu1 %v391_v0 }
  0x1b   :  { %341 = vmatpush3.bf16.msra.mxu0 %v376_v7 }
  0x1c   :  { %342 = vmatprep.subr.bf16.mxu0 %v391_v0 }
  0x1d   :  { %361 = vmatpush3.bf16.msra.mxu1 %v385_v16 }
  0x1e   :  { %362 = vmatprep.subr.bf16.mxu1 %v391_v0 }
  0x1f   :  { %343 = vmatpush3.bf16.msra.mxu0 %v377_v8 }
  0x21   :  { %363 = vmatpush3.bf16.msra.mxu1 %v386_v17 }
  0x22   :  { %345 = vmatmul.mubr.bf16.vlgmr.msra.gmra.mrb[0].mxu0 %v378_v9 }
  0xf5   :  { %v124_v19 = vpop.f32.mrb[0].mxu0 }
  0xf6   :  { %v136_v21 = vmul.f32 %v300_v18, %v124_v19  ;;  %v346_v22 = vpop.f32.mrb[1].mxu0 }
  0xf7   :  { %v127_v23 = vpop.f32.mrb[2].mxu0 }
  0xf8   :  { %v143_v24 = vadd.f32 %v301_v20, %v136_v21  ;;  %v137_v25 = vmul.f32 %v300_v18, %v127_v23  ;;  %v347_v26 = vpop.f32.mrb[3].mxu0 }
  0xfa   :  { %v147_v27 = vmul.f32 0.044715, %v143_v24  ;;  %v144_v28 = vadd.f32 %v301_v20, %v137_v25  ;;  %v145_v41 = vmul.f32 0.5, %v143_v24 }
  0xfc   :  { %v149_v29 = vmul.f32 %v147_v27, %v143_v24  ;;  %v148_v30 = vmul.f32 0.044715, %v144_v28  ;;  %v146_v42 = vmul.f32 0.5, %v144_v28 }
  0xfe   :  { %v150_v31 = vmul.f32 %v148_v30, %v144_v28  ;;  %v151_v32 = vmul.f32 %v149_v29, %v143_v24 }
 0x100   :  { %v152_v33 = vmul.f32 %v150_v31, %v144_v28  ;;  %v153_v34 = vadd.f32 %v151_v32, %v143_v24 }
 0x102   :  { %v154_v35 = vadd.f32 %v152_v33, %v144_v28  ;;  %v155_v36 = vmul.f32 0.7978846, %v153_v34 }
 0x104   :  { %v156_v37 = vmul.f32 0.7978846, %v154_v35  ;;  %387 = vtanh.f32 %v155_v36 }
 0x106   :  { %389 = vtanh.f32 %v156_v37 }
 0x10e   :  { %v388_v38 = vpop.eup %387 }
 0x10f   :  { %v159_v39 = vadd.f32 1.0, %v388_v38 }
 0x110   :  { %v390_v40 = vpop.eup %389 }
 0x111   :  { %v160_v43 = vadd.f32 1.0, %v390_v40  ;;  %v161_v44 = vmul.f32 %v159_v39, %v145_v41 }
 0x113   :  { %v162_v45 = vmul.f32 %v160_v43, %v146_v42 }
 0x115   :  { %v163_v46 = vpack.c.bf16 %v162_v45, %v161_v44 }
 0x117   :  { %365 = vmatmul.mubr.bf16.vlgmr.msra.gmra.mrb[0].mxu1 %v163_v46 }
 0x1ea   :  { %v262_v47 = vpop.f32.mrb[0].mxu1 }
 0x1eb   :  { %v366_v48 = vpop.f32.mrb[1].mxu1  ;;  %v277_v50 = vmul.f32 %v262_v47, %v262_v47 }
 0x1ec   :  { %v265_v49 = vpop.f32.mrb[2].mxu1 }
 0x1ed   :  { %v269_v51 = vadd.f32 %v265_v49, %v262_v47  ;;  %v278_v52 = vmul.f32 %v265_v49, %v265_v49  ;;  %v367_v53 = vpop.f32.mrb[3].mxu1 }
 0x1ef   :  { %v270_v54 = vrot.slane %v269_v51, 4  ;;  %v279_v55 = vadd.f32 %v278_v52, %v277_v50 }
 0x1f1   :  { %v271_v56 = vadd.f32 %v270_v54, %v269_v51  ;;  %v280_v57 = vrot.slane %v279_v55, 4 }
 0x1f3   :  { %v272_v58 = vrot.slane %v271_v56, 2  ;;  %v281_v59 = vadd.f32 %v280_v57, %v279_v55 }
 0x1f5   :  { %v273_v60 = vadd.f32 %v272_v58, %v271_v56  ;;  %v282_v61 = vrot.slane %v281_v59, 2 }
 0x1f7   :  { %v274_v62 = vrot.slane %v273_v60, 1  ;;  %v283_v63 = vadd.f32 %v282_v61, %v281_v59 }
 0x1f9   :  { %v275_v0 = vadd.f32 %v274_v62, %v273_v60  ;;  %v284_v1 = vrot.slane %v283_v63, 1 }
 0x1fb   :  { %276 = vst [vmem:[%s485_s4] sm:$0x1] %v275_v0  ;;  %v285_v2 = vadd.f32 %v284_v1, %v283_v63 }
 0x1fd   :  { %286 = vst [vmem:[%s485_s4 + $0x1] sm:$0x1] %v285_v2 }

// kernel: sparse_update_forward.17
= control target key start
LH: loop header
LB: loop body
LE: loop exit
PB: predicated region body
PF: predicated region fallthrough
CT: control target
= control target key end

     0   :  { %v416_v0 = vmov 0.0   ;;  %vm417_vm0 = vmmov 0   ;;  %s517_s1 = inlined_call_operand.vmem [shape: bf16[128,128], index: 1, kind: input, shape index: {}]   ;;  %s518_s0 = inlined_call_operand.vmem [shape: bf16[1,16,128], index: 0, kind: input, shape index: {}]   ;;  %s519_s3 = inlined_call_operand.vmem [shape: bf16[128,128], index: 3, kind: input, shape index: {}]   ;;  %s520_s2 = inlined_call_operand.vmem [shape: f32[2,128], index: 2, kind: input, shape index: {}]   ;;  %s521_s4 = inlined_call_operand.vmem [shape: f32[2,128], index: 4, kind: input, shape index: {}]   ;;  %s522_s5 = inlined_call_operand.vmem [shape: f32[16,128], index: 5, kind: output, shape index: {}]  }
   0x1   :  { %349 = vmatprep.subr.bf16.mxu0 %v416_v0  ;;  %v391_v1 = vld [vmem:[%s517_s1] sm:$0xff]   ;;  %365 = vmatprep.mubr.msk.bf16.mxu0 %vm417_vm0, %v416_v0  ;;  %v392_v2 = vld [vmem:[%s517_s1 + $0x8] sm:$0xff]   ;;  %v393_v3 = vld [vmem:[%s517_s1 + $0x10] sm:$0xff]  }
   0x2   :  { %369 = vmatprep.subr.bf16.mxu1 %v416_v0  ;;  %385 = vmatprep.mubr.msk.bf16.mxu1 %vm417_vm0, %v416_v0  ;;  %v394_v4 = vld [vmem:[%s517_s1 + $0x18] sm:$0xff]   ;;  %v395_v5 = vld [vmem:[%s517_s1 + $0x20] sm:$0xff]   ;;  %v396_v6 = vld [vmem:[%s517_s1 + $0x28] sm:$0xff]  }
   0x3   :  { %350 = vmatpush3.bf16.msra.mxu0 %v391_v1  ;;  %v397_v7 = vld [vmem:[%s517_s1 + $0x30] sm:$0xff]   ;;  %v398_v8 = vld [vmem:[%s517_s1 + $0x38] sm:$0xff]   ;;  %v399_v9 = vld [vmem:[%s518_s0] sm:$0xff]  }
   0x4   :  { %351 = vmatprep.subr.bf16.mxu0 %v416_v0  ;;  %v400_v10 = vld [vmem:[%s519_s3] sm:$0xff]   ;;  %v401_v11 = vld [vmem:[%s519_s3 + $0x8] sm:$0xff]   ;;  %v402_v12 = vld [vmem:[%s519_s3 + $0x10] sm:$0xff]  }
   0x5   :  { %370 = vmatpush3.bf16.msra.mxu1 %v400_v10  ;;  %v403_v13 = vld [vmem:[%s519_s3 + $0x18] sm:$0xff]   ;;  %v404_v14 = vld [vmem:[%s519_s3 + $0x20] sm:$0xff]   ;;  %v405_v15 = vld [vmem:[%s519_s3 + $0x28] sm:$0xff]  }
   0x6   :  { %371 = vmatprep.subr.bf16.mxu1 %v416_v0  ;;  %v406_v16 = vld [vmem:[%s519_s3 + $0x30] sm:$0xff]   ;;  %v407_v17 = vld [vmem:[%s519_s3 + $0x38] sm:$0xff]   ;;  %v319_v18 = vld [vmem:[%s520_s2] ss:$0 sm:$0xff] }
   0x7   :  { %352 = vmatpush3.bf16.msra.mxu0 %v392_v2  ;;  %v320_v20 = vld [vmem:[%s520_s2 + $0x1] ss:$0 sm:$0xff]  ;;  %v329_v47 = vld [vmem:[%s521_s4] ss:$0 sm:$0xff] }
   0x8   :  { %353 = vmatprep.subr.bf16.mxu0 %v416_v0  ;;  %v330_v49 = vld [vmem:[%s521_s4 + $0x1] ss:$0 sm:$0xff] }
   0x9   :  { %372 = vmatpush3.bf16.msra.mxu1 %v401_v11 }
   0xa   :  { %373 = vmatprep.subr.bf16.mxu1 %v416_v0 }
   0xb   :  { %354 = vmatpush3.bf16.msra.mxu0 %v393_v3 }
   0xc   :  { %355 = vmatprep.subr.bf16.mxu0 %v416_v0 }
   0xd   :  { %374 = vmatpush3.bf16.msra.mxu1 %v402_v12 }
   0xe   :  { %375 = vmatprep.subr.bf16.mxu1 %v416_v0 }
   0xf   :  { %356 = vmatpush3.bf16.msra.mxu0 %v394_v4 }
  0x10   :  { %357 = vmatprep.subr.bf16.mxu0 %v416_v0 }
  0x11   :  { %376 = vmatpush3.bf16.msra.mxu1 %v403_v13 }
  0x12   :  { %377 = vmatprep.subr.bf16.mxu1 %v416_v0 }
  0x13   :  { %358 = vmatpush3.bf16.msra.mxu0 %v395_v5 }
  0x14   :  { %359 = vmatprep.subr.bf16.mxu0 %v416_v0 }
  0x15   :  { %378 = vmatpush3.bf16.msra.mxu1 %v404_v14 }
  0x16   :  { %379 = vmatprep.subr.bf16.mxu1 %v416_v0 }
  0x17   :  { %360 = vmatpush3.bf16.msra.mxu0 %v396_v6 }
  0x18   :  { %361 = vmatprep.subr.bf16.mxu0 %v416_v0 }
  0x19   :  { %380 = vmatpush3.bf16.msra.mxu1 %v405_v15 }
  0x1a   :  { %381 = vmatprep.subr.bf16.mxu1 %v416_v0 }
  0x1b   :  { %362 = vmatpush3.bf16.msra.mxu0 %v397_v7 }
  0x1c   :  { %363 = vmatprep.subr.bf16.mxu0 %v416_v0 }
  0x1d   :  { %382 = vmatpush3.bf16.msra.mxu1 %v406_v16 }
  0x1e   :  { %383 = vmatprep.subr.bf16.mxu1 %v416_v0 }
  0x1f   :  { %364 = vmatpush3.bf16.msra.mxu0 %v398_v8 }
  0x21   :  { %384 = vmatpush3.bf16.msra.mxu1 %v407_v17 }
  0x22   :  { %366 = vmatmul.mubr.bf16.vlgmr.msra.gmra.mrb[0].mxu0 %v399_v9 }
  0xf5   :  { %v127_v19 = vpop.f32.mrb[0].mxu0 }
  0xf6   :  { %v139_v21 = vmul.f32 %v319_v18, %v127_v19  ;;  %v367_v22 = vpop.f32.mrb[1].mxu0 }
  0xf7   :  { %v130_v23 = vpop.f32.mrb[2].mxu0 }
  0xf8   :  { %v146_v24 = vadd.f32 %v320_v20, %v139_v21  ;;  %v140_v25 = vmul.f32 %v319_v18, %v130_v23  ;;  %v368_v26 = vpop.f32.mrb[3].mxu0 }
  0xfa   :  { %v150_v27 = vmul.f32 0.044715, %v146_v24  ;;  %v147_v28 = vadd.f32 %v320_v20, %v140_v25  ;;  %v148_v41 = vmul.f32 0.5, %v146_v24 }
  0xfc   :  { %v152_v29 = vmul.f32 %v150_v27, %v146_v24  ;;  %v151_v30 = vmul.f32 0.044715, %v147_v28  ;;  %v149_v42 = vmul.f32 0.5, %v147_v28 }
  0xfe   :  { %v153_v31 = vmul.f32 %v151_v30, %v147_v28  ;;  %v154_v32 = vmul.f32 %v152_v29, %v146_v24 }
 0x100   :  { %v155_v33 = vmul.f32 %v153_v31, %v147_v28  ;;  %v156_v34 = vadd.f32 %v154_v32, %v146_v24 }
 0x102   :  { %v157_v35 = vadd.f32 %v155_v33, %v147_v28  ;;  %v158_v36 = vmul.f32 0.7978846, %v156_v34 }
 0x104   :  { %v159_v37 = vmul.f32 0.7978846, %v157_v35  ;;  %408 = vtanh.f32 %v158_v36 }
 0x106   :  { %410 = vtanh.f32 %v159_v37 }
 0x10e   :  { %v409_v38 = vpop.eup %408 }
 0x10f   :  { %v162_v39 = vadd.f32 1.0, %v409_v38 }
 0x110   :  { %v411_v40 = vpop.eup %410 }
 0x111   :  { %v163_v43 = vadd.f32 1.0, %v411_v40  ;;  %v164_v44 = vmul.f32 %v162_v39, %v148_v41 }
 0x113   :  { %v165_v45 = vmul.f32 %v163_v43, %v149_v42 }
 0x115   :  { %v166_v46 = vpack.c.bf16 %v165_v45, %v164_v44 }
 0x117   :  { %386 = vmatmul.mubr.bf16.vlgmr.msra.gmra.mrb[0].mxu1 %v166_v46 }
 0x1ea   :  { %v265_v48 = vpop.f32.mrb[0].mxu1 }
 0x1eb   :  { %v277_v50 = vmul.f32 %v329_v47, %v265_v48  ;;  %v387_v51 = vpop.f32.mrb[1].mxu1 }
 0x1ec   :  { %v268_v52 = vpop.f32.mrb[2].mxu1 }
 0x1ed   :  { %v284_v53 = vadd.f32 %v330_v49, %v277_v50  ;;  %v278_v54 = vmul.f32 %v329_v47, %v268_v52  ;;  %v388_v55 = vpop.f32.mrb[3].mxu1 }
 0x1ef   :  { %v288_v56 = vmul.f32 0.044715, %v284_v53  ;;  %v285_v57 = vadd.f32 %v330_v49, %v278_v54  ;;  %v286_v4 = vmul.f32 0.5, %v284_v53 }
 0x1f1   :  { %v290_v58 = vmul.f32 %v288_v56, %v284_v53  ;;  %v289_v59 = vmul.f32 0.044715, %v285_v57  ;;  %v287_v8 = vmul.f32 0.5, %v285_v57 }
 0x1f3   :  { %v292_v60 = vmul.f32 %v290_v58, %v284_v53  ;;  %v291_v61 = vmul.f32 %v289_v59, %v285_v57 }
 0x1f5   :  { %v294_v62 = vadd.f32 %v292_v60, %v284_v53  ;;  %v293_v63 = vmul.f32 %v291_v61, %v285_v57 }
 0x1f7   :  { %v296_v0 = vmul.f32 0.7978846, %v294_v62  ;;  %v295_v1 = vadd.f32 %v293_v63, %v285_v57 }
 0x1f9   :  { %412 = vtanh.f32 %v296_v0  ;;  %v297_v2 = vmul.f32 0.7978846, %v295_v1 }
 0x1fb   :  { %414 = vtanh.f32 %v297_v2 }
 0x203   :  { %v413_v3 = vpop.eup %412 }
 0x204   :  { %v300_v5 = vadd.f32 1.0, %v413_v3 }
 0x205   :  { %v415_v6 = vpop.eup %414 }
 0x206   :  { %v302_v7 = vmul.f32 %v300_v5, %v286_v4  ;;  %v301_v9 = vadd.f32 1.0, %v415_v6 }
 0x208   :  { %304 = vst [vmem:[%s522_s5] sm:$0xff] %v302_v7  ;;  %v303_v10 = vmul.f32 %v301_v9, %v287_v8 }
 0x20a   :  { %305 = vst [vmem:[%s522_s5 + $0x8] sm:$0xff] %v303_v10 }

</bundles_post_ra>
